<compile_context>
chip_gen: v7x
topology: tpu7x:2x2x1
jax: 0.10.0
libtpu: 0.0.40
codegen_flags: <defaults>
</compile_context>

<pallas_src>
import functools

import numpy as np
import jax
import jax.numpy as jnp
from jax import lax
from jax.experimental import pallas as pl
from jax.experimental.pallas import tpu as pltpu


# -----------------------------------------------------------------------------
# helpers: chip-conditional tiling / VMEM budget
# -----------------------------------------------------------------------------
def _round_up(x, m):
    return ((x + m - 1) // m) * m


@functools.lru_cache(maxsize=None)
def _tpu_budget():
    """Returns (vmem_limit_bytes, two_tensorcores) with safe fallbacks."""
    kind = ""
    try:
        kind = jax.devices()[0].device_kind.lower()
    except Exception:
        pass
    two_tc = ("v7" in kind) or ("tpu7" in kind)
    vmem_phys = 0
    try:
        vmem_phys = int(pltpu.get_tpu_info().vmem_capacity_bytes)
    except Exception:
        if ("v5" in kind) or ("v6" in kind):
            vmem_phys = 128 << 20
        elif two_tc:
            vmem_phys = 64 << 20
    if vmem_phys:
        vmem_limit = max(32 << 20, min(96 << 20, vmem_phys // 2))
    else:
        vmem_limit = 32 << 20          # conservative default, always compiles
    return vmem_limit, two_tc


def _pick_tile(rows, two_tc):
    """Row tile: multiple of 8 sublanes.  On 2-TC chips (v7x) force >= 2 grid
    steps so both TensorCores get work; on 1-TC chips (v5e/v6e) one big tile
    (extra grid steps only add ~0.35us/step overhead there)."""
    cap = 512 if two_tc else 1024
    if two_tc and rows > 8:
        cap = min(cap, _round_up((rows + 1) // 2, 8))
    return max(8, min(cap, _round_up(rows, 8)))


# -----------------------------------------------------------------------------
# Fused kernel 1: complex mask (U-Net stand-in) + windowed IDFT (ISTFT synth)
#   Two STFT frames are packed per row -> 66 active lanes in, 128 lanes out.
# -----------------------------------------------------------------------------
def _mask_synth_kernel(xr_ref, xi_ref, w1_ref, b1_ref, w2_ref, b2_ref,
                       br_ref, bi_ref, o_ref, *, hidden):
    xr = xr_ref[...]                        # (tile_r, 2F): frame pair packed on lanes
    xi = xi_ref[...]
    # Per-bin complex mask via 2->H->2 MLP as VPU broadcast FMAs (weights in SMEM).
    mr = jnp.zeros_like(xr) + b2_ref[0, 0]
    mi = jnp.zeros_like(xr) + b2_ref[0, 1]
    for j in range(hidden):
        h = jnp.maximum(xr * w1_ref[0, j] + xi * w1_ref[1, j] + b1_ref[0, j], 0.0)
        mr = mr + h * w2_ref[j, 0]
        mi = mi + h * w2_ref[j, 1]
    yr = (xr * mr - xi * mi).astype(jnp.bfloat16)   # masked spectrogram (complex mult)
    yi = (xr * mi + xi * mr).astype(jnp.bfloat16)
    # Windowed one-sided inverse DFT on the MXU; bases are block-diagonal over the
    # frame pair, so the output row is [frame_even | frame_odd] = 128 dense lanes.
    o_ref[...] = (jnp.dot(yr, br_ref[...], preferred_element_type=jnp.float32)
                  + jnp.dot(yi, bi_ref[...], preferred_element_type=jnp.float32))


@functools.lru_cache(maxsize=None)
def _istft_consts(win_len, hop_len, n_frames):
    """Hoisted constants: frame-pair block-diagonal windowed-IDFT bases (bf16)
    and the squared-window OLA envelope (f32)."""
    N = win_len
    F_ = N // 2 + 1
    n = np.arange(N, dtype=np.float64)
    win = 0.5 - 0.5 * np.cos(2.0 * np.pi * n / N)            # periodic hann
    k = np.arange(F_, dtype=np.float64)[:, None]
    ang = 2.0 * np.pi * k * n[None, :] / N
    c = np.where((np.arange(F_) == 0) | (np.arange(F_) == F_ - 1), 1.0, 2.0)[:, None]
    cosb = (c * np.cos(ang) / N) * win[None, :]               # (F, N), window folded in
    sinb = (-c * np.sin(ang) / N) * win[None, :]
    # frame-pair packed block-diagonal bases: (2F, 2N), 128-lane output
    br = np.zeros((2 * F_, 2 * N))
    bi = np.zeros((2 * F_, 2 * N))
    br[:F_, :N] = cosb
    br[F_:, N:] = cosb
    bi[:F_, :N] = sinb
    bi[F_:, N:] = sinb
    # squared-window OLA envelope (normalisation), constant for fixed T
    r = N // hop_len
    nchunks = n_frames + r - 1
    wsq = (win * win).reshape(r, hop_len)
    env = np.zeros((nchunks, hop_len))
    for q in range(r):
        env[q:q + n_frames, :] += wsq[q][None, :]
    env = env.reshape(-1)
    half = N // 2
    env = env[half:nchunks * hop_len - half]
    return (jnp.asarray(br, jnp.bfloat16),
            jnp.asarray(bi, jnp.bfloat16),
            jnp.asarray(env, jnp.float32))


def masked_istft(x_real, x_imag, unet_params, win_len, hop_len):
    """u_net (complex mask stand-in) + batch_istft fused. Returns (B, 1, (T-1)*hop)."""
    B, C, F_, T = x_real.shape
    N = win_len
    assert C == 1 and F_ == N // 2 + 1 and N % hop_len == 0
    br, bi, env = _istft_consts(win_len, hop_len, T)

    # (B, 1, F, T) -> (B*T, F): rows = frames, lanes = frequency bins.
    xr = x_real[:, 0].transpose(0, 2, 1).reshape(B * T, F_)
    xi = x_imag[:, 0].transpose(0, 2, 1).reshape(B * T, F_)

    rows = B * T
    rows_pad = rows + (rows % 2)
    if rows_pad != rows:
        xr = jnp.pad(xr, ((0, 1), (0, 0)))
        xi = jnp.pad(xi, ((0, 1), (0, 0)))
    Rp = rows_pad // 2
    xr_p = xr.reshape(Rp, 2 * F_)            # two consecutive frames per row
    xi_p = xi.reshape(Rp, 2 * F_)

    H = unet_params["W1"].shape[1]
    vmem_limit, two_tc = _tpu_budget()
    tile_r = _pick_tile(Rp, two_tc)
    smem = pl.BlockSpec(memory_space=pltpu.MemorySpace.SMEM)

    flops = 2 * Rp * (2 * F_) * (2 * N) * 2 + Rp * (2 * F_) * (8 * H + 8)
    bytes_acc = (Rp * (2 * F_) * 4 * 2          # xr_p, xi_p (f32)
                 + Rp * (2 * N) * 4             # frames out (f32)
                 + 2 * (2 * F_) * (2 * N) * 2)  # bases (bf16)

    frames = pl.pallas_call(
        functools.partial(_mask_synth_kernel, hidden=H),
        out_shape=jax.ShapeDtypeStruct((Rp, 2 * N), jnp.float32),
        grid=(pl.cdiv(Rp, tile_r),),
        in_specs=[
            pl.BlockSpec((tile_r, 2 * F_), lambda i: (i, 0)),
            pl.BlockSpec((tile_r, 2 * F_), lambda i: (i, 0)),
            smem, smem, smem, smem,                           # tiny MLP weights in SMEM
            pl.BlockSpec((2 * F_, 2 * N), lambda i: (0, 0)),  # IDFT bases resident
            pl.BlockSpec((2 * F_, 2 * N), lambda i: (0, 0)),
        ],
        out_specs=pl.BlockSpec((tile_r, 2 * N), lambda i: (i, 0)),
        compiler_params=pltpu.CompilerParams(
            dimension_semantics=("parallel",),
            vmem_limit_bytes=vmem_limit),
        cost_estimate=pl.CostEstimate(flops=int(flops), transcendentals=0,
                                      bytes_accessed=int(bytes_acc)),
    )(xr_p, xi_p,
      unet_params["W1"], unet_params["b1"], unet_params["W2"], unet_params["b2"],
      br, bi)

    # Undo the frame-pair packing with a cheap wrapper reshape.
    frames = frames.reshape(rows_pad, N)[:rows]

    # Overlap-add: hop divides N, so OLA = fixed sum of N//hop shifted chunk
    # views (static slice-adds; no scatter).
    r = N // hop_len
    fr = frames.reshape(B, T, r, hop_len)
    nchunks = T + r - 1
    sig = jnp.zeros((B, nchunks, hop_len), jnp.float32)
    for q in range(r):
        sig = sig.at[:, q:q + T, :].add(fr[:, :, q, :])
    sig = sig.reshape(B, nchunks * hop_len)
    half = N // 2
    sig = sig[:, half:nchunks * hop_len - half]
    sig = sig / jnp.maximum(env, 1e-8)[None, :]
    return sig[:, None, :]                                  # (B, 1, (T-1)*hop)


# -----------------------------------------------------------------------------
# Fused kernel 2: whole ConvTasNet (encoder / TCN / mask / masked decode)
# -----------------------------------------------------------------------------
def _tasnet_kernel(fr_ref, we_ref, be_ref, wb_ref, bb_ref,
                   w1s_ref, b1s_ref, w2s_ref, b2s_ref,
                   wm_ref, bm_ref, rep_ref, wd_ref, bd_ref, o_ref,
                   *, nblocks, num_src):
    cdt = jnp.bfloat16
    fr = fr_ref[...].astype(cdt)                                        # (tm, L)
    enc = jnp.maximum(
        jnp.dot(fr, we_ref[...], preferred_element_type=jnp.float32) + be_ref[...],
        0.0)                                                            # (tm, filters)
    x = jnp.dot(enc.astype(cdt), wb_ref[...],
                preferred_element_type=jnp.float32) + bb_ref[...]       # (tm, tcn_io)

    def blk(i, xc):                                                     # residual 1x1 TCN
        h = jnp.maximum(
            jnp.dot(xc.astype(cdt), w1s_ref[i],
                    preferred_element_type=jnp.float32) + b1s_ref[i], 0.0)
        return xc + jnp.dot(h.astype(cdt), w2s_ref[i],
                            preferred_element_type=jnp.float32) + b2s_ref[i]

    x = lax.fori_loop(0, nblocks, blk, x)

    mask = jax.nn.sigmoid(
        jnp.dot(x.astype(cdt), wm_ref[...],
                preferred_element_type=jnp.float32) + bm_ref[...])      # (tm, ns*filters)
    # Replicate the encoder output across sources with an [I|I|...] matmul
    # (MXU has slack; avoids unaligned lane shuffles), then one stacked decode
    # against the block-diagonal decoder and ONE output store.
    enc_rep = jnp.dot(enc.astype(cdt), rep_ref[...],
                      preferred_element_type=jnp.float32)               # (tm, ns*filters)
    masked = (enc_rep * mask).astype(cdt)
    o_ref[...] = jnp.dot(masked, wd_ref[...],
                         preferred_element_type=jnp.float32) + bd_ref[...]


def conv_tasnet(wav, p, segment_len, stride_frac, num_src):
    # wav: (B, 1, S)
    B, _, S = wav.shape
    L = segment_len
    hop = int(L * stride_frac)
    assert L % hop == 0 and S % hop == 0 and S >= L
    ratio = L // hop
    K = (S - L) // hop + 1

    # Frame extraction as static slices of hop-chunks (hop | L): no gather.
    ch = wav[:, 0, :].reshape(B, S // hop, hop)
    frames = jnp.concatenate([ch[:, q:q + K, :] for q in range(ratio)],
                             axis=-1).reshape(B * K, L)                 # (B*K, L)

    filters = p["We"].shape[1]
    tcn_io = p["Wb"].shape[1]
    tcn_hid = p["W1s"].shape[2]
    nblocks = p["W1s"].shape[0]
    M = B * K

    cdt = jnp.bfloat16
    we = p["We"].astype(cdt)
    wb = p["Wb"].astype(cdt)
    w1s = p["W1s"].astype(cdt)
    w2s = p["W2s"].astype(cdt)
    wm = p["Wm"].astype(cdt)
    # [I | I | ...] encoder-replication matrix and block-diagonal decoder.
    rep = jnp.concatenate([jnp.eye(filters, dtype=jnp.float32)] * num_src,
                          axis=1).astype(cdt)                           # (f, ns*f)
    wd_bd = jnp.zeros((num_src * filters, num_src * L), jnp.float32)
    for s in range(num_src):
        wd_bd = wd_bd.at[s * filters:(s + 1) * filters,
                         s * L:(s + 1) * L].set(p["Wd"])
    wd_bd = wd_bd.astype(cdt)                                           # (ns*f, ns*L)
    bd_bd = jnp.concatenate([p["bd"]] * num_src, axis=-1)               # (1, ns*L)

    vmem_limit, two_tc = _tpu_budget()
    tile_m = _pick_tile(M, two_tc)

    def full(a):
        return pl.BlockSpec(a.shape, lambda i, nd=a.ndim: (0,) * nd)

    mm_k = (L * filters + filters * tcn_io
            + nblocks * (tcn_io * tcn_hid + tcn_hid * tcn_io)
            + tcn_io * num_src * filters
            + filters * num_src * filters
            + num_src * filters * num_src * L)
    flops = 2 * M * mm_k
    trans = M * num_src * filters
    wbytes = 2 * (we.size + wb.size + w1s.size + w2s.size + wm.size
                  + rep.size + wd_bd.size)
    bytes_acc = M * L * 4 + M * num_src * L * 4 + int(wbytes)

    dec = pl.pallas_call(
        functools.partial(_tasnet_kernel, nblocks=nblocks, num_src=num_src),
        out_shape=jax.ShapeDtypeStruct((M, num_src * L), jnp.float32),
        grid=(pl.cdiv(M, tile_m),),
        in_specs=[pl.BlockSpec((tile_m, L), lambda i: (i, 0)),
                  full(we), full(p["be"]), full(wb), full(p["bb"]),
                  full(w1s), full(p["b1s"]), full(w2s), full(p["b2s"]),
                  full(wm), full(p["bm"]), full(rep), full(wd_bd), full(bd_bd)],
        out_specs=pl.BlockSpec((tile_m, num_src * L), lambda i: (i, 0)),
        compiler_params=pltpu.CompilerParams(
            dimension_semantics=("parallel",),
            vmem_limit_bytes=vmem_limit),
        cost_estimate=pl.CostEstimate(flops=int(flops), transcendentals=int(trans),
                                      bytes_accessed=int(bytes_acc)),
    )(frames, we, p["be"], wb, p["bb"],
      w1s, p["b1s"], w2s, p["b2s"],
      wm, p["bm"], rep, wd_bd, bd_bd)

    dec = dec.reshape(B, K, num_src, L).transpose(0, 2, 1, 3)           # (B, ns, K, L)

    # Transposed-conv overlap-add as shift-and-sum of hop chunks (no scatter).
    d = dec.reshape(B, num_src, K, ratio, hop)
    nchunks = K + ratio - 1
    out = jnp.zeros((B, num_src, nchunks, hop), jnp.float32)
    for q in range(ratio):
        out = out.at[:, :, q:q + K, :].add(d[:, :, :, q, :])
    out = out.reshape(B, num_src, nchunks * hop)
    out_len = (K - 1) * hop + L
    return out[:, :, :out_len]                                          # (B, ns, S)


# -----------------------------------------------------------------------------
# Parameters + full forward
# -----------------------------------------------------------------------------
def init_params(key, *, unet_hidden, filters, segment_len, tcn_io, tcn_hid,
                conv_blocks, num_tcns, num_src):
    keys = jax.random.split(key, 8)

    def w(k, shape, scale=0.1):
        return scale * jax.random.normal(k, shape, jnp.float32)

    nblk = num_tcns * conv_blocks
    unet = dict(W1=w(keys[0], (2, unet_hidden)),
                b1=jnp.zeros((1, unet_hidden), jnp.float32),
                W2=w(keys[1], (unet_hidden, 2)),
                b2=jnp.zeros((1, 2), jnp.float32))
    tasnet = dict(
        We=w(keys[2], (segment_len, filters)),
        be=jnp.zeros((1, filters), jnp.float32),
        Wb=w(keys[3], (filters, tcn_io)),
        bb=jnp.zeros((1, tcn_io), jnp.float32),
        W1s=w(keys[4], (nblk, tcn_io, tcn_hid)),
        b1s=jnp.zeros((nblk, 1, tcn_hid), jnp.float32),
        W2s=w(keys[5], (nblk, tcn_hid, tcn_io)),
        b2s=jnp.zeros((nblk, 1, tcn_io), jnp.float32),
        Wm=w(keys[6], (tcn_io, num_src * filters)),
        bm=jnp.zeros((1, num_src * filters), jnp.float32),
        Wd=w(keys[7], (filters, segment_len)),
        bd=jnp.zeros((1, segment_len), jnp.float32))
    return dict(unet=unet, tasnet=tasnet)


def source_separator_forward(x_real, x_imag, params, cfg):
    out = {}
    # u_net (complex mask stand-in) + batch_istft, fused in one Pallas kernel
    wav = masked_istft(x_real, x_imag, params["unet"],
                       cfg["win_len_sam"], cfg["hop_len_sam"])
    out["m1_out"] = wav
    if cfg["sep_net"]:
        out["m2_out"] = conv_tasnet(wav, params["tasnet"], cfg["segment_len"],
                                    cfg["stride"], cfg["num_src"])
    return out


if __name__ == "__main__":
    # Small config consistent with the module's constructor semantics.
    sr, win_s, hop_len_s = 1000, 0.064, 0.016
    win_len_sam = int(round(win_s * sr))          # 64  (n_fft)
    hop_len_sam = int(round(hop_len_s * sr))      # 16
    B, C, F_, T = 2, 1, win_len_sam // 2 + 1, 17  # complex spec (B, 1, 33, 17)
    in_samples = (T - 1) * hop_len_sam            # 256 = istft output length

    cfg = dict(win_len_sam=win_len_sam, hop_len_sam=hop_len_sam,
               segment_len=16, stride=0.5, sep_net=True, num_src=2,
               in_samples=in_samples)

    key = jax.random.PRNGKey(0)
    kp, kr, ki = jax.random.split(key, 3)
    params = init_params(kp, unet_hidden=16, filters=64, segment_len=16,
                         tcn_io=32, tcn_hid=64, conv_blocks=2, num_tcns=2,
                         num_src=2)
    x_real = jax.random.normal(kr, (B, C, F_, T), jnp.float32)
    x_imag = jax.random.normal(ki, (B, C, F_, T), jnp.float32)

    fwd = jax.jit(functools.partial(source_separator_forward, cfg=cfg))
    out = fwd(x_real, x_imag, params)
    jax.block_until_ready(out)
    assert out["m1_out"].shape == (B, 1, in_samples)
    assert out["m2_out"].shape == (B, 2, in_samples)
    print("KERNEL_OK")
</pallas_src>

<mosaic_0001>
module attributes {stable_mosaic.version = 11 : i64} {
  func.func @_mask_synth_kernel(%arg0: i32, %arg1: memref<24x66xf32, #tpu.memory_space<vmem>>, %arg2: memref<24x66xf32, #tpu.memory_space<vmem>>, %arg3: memref<2x16xf32, #tpu.memory_space<smem>>, %arg4: memref<1x16xf32, #tpu.memory_space<smem>>, %arg5: memref<16x2xf32, #tpu.memory_space<smem>>, %arg6: memref<1x2xf32, #tpu.memory_space<smem>>, %arg7: memref<66x128xbf16, #tpu.memory_space<vmem>>, %arg8: memref<66x128xbf16, #tpu.memory_space<vmem>>, %arg9: memref<24x128xf32, #tpu.memory_space<vmem>>) attributes {dimension_semantics = [#tpu.dimension_semantics<parallel>], iteration_bounds = array<i64: 1>, scalar_prefetch = 0 : i64, scratch_operands = 0 : i64, tpu.core_type = #tpu.core_type<tc>, window_params = [{transform_indices = @transform_0, window_bounds = array<i64: 24, 66>}, {transform_indices = @transform_1, window_bounds = array<i64: 24, 66>}, {transform_indices = @transform_2, window_bounds = array<i64: 2, 16>}, {transform_indices = @transform_3, window_bounds = array<i64: 1, 16>}, {transform_indices = @transform_4, window_bounds = array<i64: 16, 2>}, {transform_indices = @transform_5, window_bounds = array<i64: 1, 2>}, {pipeline_mode = #tpu.pipeline_mode<synchronous>, transform_indices = @transform_6, window_bounds = array<i64: 66, 128>}, {pipeline_mode = #tpu.pipeline_mode<synchronous>, transform_indices = @transform_7, window_bounds = array<i64: 66, 128>}, {transform_indices = @transform_8, window_bounds = array<i64: 24, 128>}]} {
    %c0 = arith.constant 0 : index
    %c0_0 = arith.constant 0 : index
    %0 = vector.load %arg1[%c0, %c0_0] : memref<24x66xf32, #tpu.memory_space<vmem>>, vector<24x66xf32>
    %c0_1 = arith.constant 0 : index
    %c0_2 = arith.constant 0 : index
    %1 = vector.load %arg2[%c0_1, %c0_2] : memref<24x66xf32, #tpu.memory_space<vmem>>, vector<24x66xf32>
    %cst = arith.constant 0.000000e+00 : f32
    %2 = vector.broadcast %cst : f32 to vector<24x66xf32>
    %c0_3 = arith.constant 0 : index
    %c0_4 = arith.constant 0 : index
    %3 = memref.load %arg6[%c0_3, %c0_4] : memref<1x2xf32, #tpu.memory_space<smem>>
    %4 = vector.broadcast %3 : f32 to vector<24x66xf32>
    %5 = arith.addf %2, %4 : vector<24x66xf32>
    %cst_5 = arith.constant 0.000000e+00 : f32
    %6 = vector.broadcast %cst_5 : f32 to vector<24x66xf32>
    %c0_6 = arith.constant 0 : index
    %c1 = arith.constant 1 : index
    %7 = memref.load %arg6[%c0_6, %c1] : memref<1x2xf32, #tpu.memory_space<smem>>
    %8 = vector.broadcast %7 : f32 to vector<24x66xf32>
    %9 = arith.addf %6, %8 : vector<24x66xf32>
    %c0_7 = arith.constant 0 : index
    %c0_8 = arith.constant 0 : index
    %10 = memref.load %arg3[%c0_7, %c0_8] : memref<2x16xf32, #tpu.memory_space<smem>>
    %11 = vector.broadcast %10 : f32 to vector<24x66xf32>
    %12 = arith.mulf %0, %11 : vector<24x66xf32>
    %c1_9 = arith.constant 1 : index
    %c0_10 = arith.constant 0 : index
    %13 = memref.load %arg3[%c1_9, %c0_10] : memref<2x16xf32, #tpu.memory_space<smem>>
    %14 = vector.broadcast %13 : f32 to vector<24x66xf32>
    %15 = arith.mulf %1, %14 : vector<24x66xf32>
    %16 = arith.addf %12, %15 : vector<24x66xf32>
    %c0_11 = arith.constant 0 : index
    %c0_12 = arith.constant 0 : index
    %17 = memref.load %arg4[%c0_11, %c0_12] : memref<1x16xf32, #tpu.memory_space<smem>>
    %18 = vector.broadcast %17 : f32 to vector<24x66xf32>
    %19 = arith.addf %16, %18 : vector<24x66xf32>
    %cst_13 = arith.constant 0.000000e+00 : f32
    %20 = vector.broadcast %cst_13 : f32 to vector<24x66xf32>
    %21 = arith.maximumf %19, %20 : vector<24x66xf32>
    %c0_14 = arith.constant 0 : index
    %c0_15 = arith.constant 0 : index
    %22 = memref.load %arg5[%c0_14, %c0_15] : memref<16x2xf32, #tpu.memory_space<smem>>
    %23 = vector.broadcast %22 : f32 to vector<24x66xf32>
    %24 = arith.mulf %21, %23 : vector<24x66xf32>
    %25 = arith.addf %5, %24 : vector<24x66xf32>
    %c0_16 = arith.constant 0 : index
    %c1_17 = arith.constant 1 : index
    %26 = memref.load %arg5[%c0_16, %c1_17] : memref<16x2xf32, #tpu.memory_space<smem>>
    %27 = vector.broadcast %26 : f32 to vector<24x66xf32>
    %28 = arith.mulf %21, %27 : vector<24x66xf32>
    %29 = arith.addf %9, %28 : vector<24x66xf32>
    %c0_18 = arith.constant 0 : index
    %c1_19 = arith.constant 1 : index
    %30 = memref.load %arg3[%c0_18, %c1_19] : memref<2x16xf32, #tpu.memory_space<smem>>
    %31 = vector.broadcast %30 : f32 to vector<24x66xf32>
    %32 = arith.mulf %0, %31 : vector<24x66xf32>
    %c1_20 = arith.constant 1 : index
    %c1_21 = arith.constant 1 : index
    %33 = memref.load %arg3[%c1_20, %c1_21] : memref<2x16xf32, #tpu.memory_space<smem>>
    %34 = vector.broadcast %33 : f32 to vector<24x66xf32>
    %35 = arith.mulf %1, %34 : vector<24x66xf32>
    %36 = arith.addf %32, %35 : vector<24x66xf32>
    %c0_22 = arith.constant 0 : index
    %c1_23 = arith.constant 1 : index
    %37 = memref.load %arg4[%c0_22, %c1_23] : memref<1x16xf32, #tpu.memory_space<smem>>
    %38 = vector.broadcast %37 : f32 to vector<24x66xf32>
    %39 = arith.addf %36, %38 : vector<24x66xf32>
    %cst_24 = arith.constant 0.000000e+00 : f32
    %40 = vector.broadcast %cst_24 : f32 to vector<24x66xf32>
    %41 = arith.maximumf %39, %40 : vector<24x66xf32>
    %c1_25 = arith.constant 1 : index
    %c0_26 = arith.constant 0 : index
    %42 = memref.load %arg5[%c1_25, %c0_26] : memref<16x2xf32, #tpu.memory_space<smem>>
    %43 = vector.broadcast %42 : f32 to vector<24x66xf32>
    %44 = arith.mulf %41, %43 : vector<24x66xf32>
    %45 = arith.addf %25, %44 : vector<24x66xf32>
    %c1_27 = arith.constant 1 : index
    %c1_28 = arith.constant 1 : index
    %46 = memref.load %arg5[%c1_27, %c1_28] : memref<16x2xf32, #tpu.memory_space<smem>>
    %47 = vector.broadcast %46 : f32 to vector<24x66xf32>
    %48 = arith.mulf %41, %47 : vector<24x66xf32>
    %49 = arith.addf %29, %48 : vector<24x66xf32>
    %c0_29 = arith.constant 0 : index
    %c2 = arith.constant 2 : index
    %50 = memref.load %arg3[%c0_29, %c2] : memref<2x16xf32, #tpu.memory_space<smem>>
    %51 = vector.broadcast %50 : f32 to vector<24x66xf32>
    %52 = arith.mulf %0, %51 : vector<24x66xf32>
    %c1_30 = arith.constant 1 : index
    %c2_31 = arith.constant 2 : index
    %53 = memref.load %arg3[%c1_30, %c2_31] : memref<2x16xf32, #tpu.memory_space<smem>>
    %54 = vector.broadcast %53 : f32 to vector<24x66xf32>
    %55 = arith.mulf %1, %54 : vector<24x66xf32>
    %56 = arith.addf %52, %55 : vector<24x66xf32>
    %c0_32 = arith.constant 0 : index
    %c2_33 = arith.constant 2 : index
    %57 = memref.load %arg4[%c0_32, %c2_33] : memref<1x16xf32, #tpu.memory_space<smem>>
    %58 = vector.broadcast %57 : f32 to vector<24x66xf32>
    %59 = arith.addf %56, %58 : vector<24x66xf32>
    %cst_34 = arith.constant 0.000000e+00 : f32
    %60 = vector.broadcast %cst_34 : f32 to vector<24x66xf32>
    %61 = arith.maximumf %59, %60 : vector<24x66xf32>
    %c2_35 = arith.constant 2 : index
    %c0_36 = arith.constant 0 : index
    %62 = memref.load %arg5[%c2_35, %c0_36] : memref<16x2xf32, #tpu.memory_space<smem>>
    %63 = vector.broadcast %62 : f32 to vector<24x66xf32>
    %64 = arith.mulf %61, %63 : vector<24x66xf32>
    %65 = arith.addf %45, %64 : vector<24x66xf32>
    %c2_37 = arith.constant 2 : index
    %c1_38 = arith.constant 1 : index
    %66 = memref.load %arg5[%c2_37, %c1_38] : memref<16x2xf32, #tpu.memory_space<smem>>
    %67 = vector.broadcast %66 : f32 to vector<24x66xf32>
    %68 = arith.mulf %61, %67 : vector<24x66xf32>
    %69 = arith.addf %49, %68 : vector<24x66xf32>
    %c0_39 = arith.constant 0 : index
    %c3 = arith.constant 3 : index
    %70 = memref.load %arg3[%c0_39, %c3] : memref<2x16xf32, #tpu.memory_space<smem>>
    %71 = vector.broadcast %70 : f32 to vector<24x66xf32>
    %72 = arith.mulf %0, %71 : vector<24x66xf32>
    %c1_40 = arith.constant 1 : index
    %c3_41 = arith.constant 3 : index
    %73 = memref.load %arg3[%c1_40, %c3_41] : memref<2x16xf32, #tpu.memory_space<smem>>
    %74 = vector.broadcast %73 : f32 to vector<24x66xf32>
    %75 = arith.mulf %1, %74 : vector<24x66xf32>
    %76 = arith.addf %72, %75 : vector<24x66xf32>
    %c0_42 = arith.constant 0 : index
    %c3_43 = arith.constant 3 : index
    %77 = memref.load %arg4[%c0_42, %c3_43] : memref<1x16xf32, #tpu.memory_space<smem>>
    %78 = vector.broadcast %77 : f32 to vector<24x66xf32>
    %79 = arith.addf %76, %78 : vector<24x66xf32>
    %cst_44 = arith.constant 0.000000e+00 : f32
    %80 = vector.broadcast %cst_44 : f32 to vector<24x66xf32>
    %81 = arith.maximumf %79, %80 : vector<24x66xf32>
    %c3_45 = arith.constant 3 : index
    %c0_46 = arith.constant 0 : index
    %82 = memref.load %arg5[%c3_45, %c0_46] : memref<16x2xf32, #tpu.memory_space<smem>>
    %83 = vector.broadcast %82 : f32 to vector<24x66xf32>
    %84 = arith.mulf %81, %83 : vector<24x66xf32>
    %85 = arith.addf %65, %84 : vector<24x66xf32>
    %c3_47 = arith.constant 3 : index
    %c1_48 = arith.constant 1 : index
    %86 = memref.load %arg5[%c3_47, %c1_48] : memref<16x2xf32, #tpu.memory_space<smem>>
    %87 = vector.broadcast %86 : f32 to vector<24x66xf32>
    %88 = arith.mulf %81, %87 : vector<24x66xf32>
    %89 = arith.addf %69, %88 : vector<24x66xf32>
    %c0_49 = arith.constant 0 : index
    %c4 = arith.constant 4 : index
    %90 = memref.load %arg3[%c0_49, %c4] : memref<2x16xf32, #tpu.memory_space<smem>>
    %91 = vector.broadcast %90 : f32 to vector<24x66xf32>
    %92 = arith.mulf %0, %91 : vector<24x66xf32>
    %c1_50 = arith.constant 1 : index
    %c4_51 = arith.constant 4 : index
    %93 = memref.load %arg3[%c1_50, %c4_51] : memref<2x16xf32, #tpu.memory_space<smem>>
    %94 = vector.broadcast %93 : f32 to vector<24x66xf32>
    %95 = arith.mulf %1, %94 : vector<24x66xf32>
    %96 = arith.addf %92, %95 : vector<24x66xf32>
    %c0_52 = arith.constant 0 : index
    %c4_53 = arith.constant 4 : index
    %97 = memref.load %arg4[%c0_52, %c4_53] : memref<1x16xf32, #tpu.memory_space<smem>>
    %98 = vector.broadcast %97 : f32 to vector<24x66xf32>
    %99 = arith.addf %96, %98 : vector<24x66xf32>
    %cst_54 = arith.constant 0.000000e+00 : f32
    %100 = vector.broadcast %cst_54 : f32 to vector<24x66xf32>
    %101 = arith.maximumf %99, %100 : vector<24x66xf32>
    %c4_55 = arith.constant 4 : index
    %c0_56 = arith.constant 0 : index
    %102 = memref.load %arg5[%c4_55, %c0_56] : memref<16x2xf32, #tpu.memory_space<smem>>
    %103 = vector.broadcast %102 : f32 to vector<24x66xf32>
    %104 = arith.mulf %101, %103 : vector<24x66xf32>
    %105 = arith.addf %85, %104 : vector<24x66xf32>
    %c4_57 = arith.constant 4 : index
    %c1_58 = arith.constant 1 : index
    %106 = memref.load %arg5[%c4_57, %c1_58] : memref<16x2xf32, #tpu.memory_space<smem>>
    %107 = vector.broadcast %106 : f32 to vector<24x66xf32>
    %108 = arith.mulf %101, %107 : vector<24x66xf32>
    %109 = arith.addf %89, %108 : vector<24x66xf32>
    %c0_59 = arith.constant 0 : index
    %c5 = arith.constant 5 : index
    %110 = memref.load %arg3[%c0_59, %c5] : memref<2x16xf32, #tpu.memory_space<smem>>
    %111 = vector.broadcast %110 : f32 to vector<24x66xf32>
    %112 = arith.mulf %0, %111 : vector<24x66xf32>
    %c1_60 = arith.constant 1 : index
    %c5_61 = arith.constant 5 : index
    %113 = memref.load %arg3[%c1_60, %c5_61] : memref<2x16xf32, #tpu.memory_space<smem>>
    %114 = vector.broadcast %113 : f32 to vector<24x66xf32>
    %115 = arith.mulf %1, %114 : vector<24x66xf32>
    %116 = arith.addf %112, %115 : vector<24x66xf32>
    %c0_62 = arith.constant 0 : index
    %c5_63 = arith.constant 5 : index
    %117 = memref.load %arg4[%c0_62, %c5_63] : memref<1x16xf32, #tpu.memory_space<smem>>
    %118 = vector.broadcast %117 : f32 to vector<24x66xf32>
    %119 = arith.addf %116, %118 : vector<24x66xf32>
    %cst_64 = arith.constant 0.000000e+00 : f32
    %120 = vector.broadcast %cst_64 : f32 to vector<24x66xf32>
    %121 = arith.maximumf %119, %120 : vector<24x66xf32>
    %c5_65 = arith.constant 5 : index
    %c0_66 = arith.constant 0 : index
    %122 = memref.load %arg5[%c5_65, %c0_66] : memref<16x2xf32, #tpu.memory_space<smem>>
    %123 = vector.broadcast %122 : f32 to vector<24x66xf32>
    %124 = arith.mulf %121, %123 : vector<24x66xf32>
    %125 = arith.addf %105, %124 : vector<24x66xf32>
    %c5_67 = arith.constant 5 : index
    %c1_68 = arith.constant 1 : index
    %126 = memref.load %arg5[%c5_67, %c1_68] : memref<16x2xf32, #tpu.memory_space<smem>>
    %127 = vector.broadcast %126 : f32 to vector<24x66xf32>
    %128 = arith.mulf %121, %127 : vector<24x66xf32>
    %129 = arith.addf %109, %128 : vector<24x66xf32>
    %c0_69 = arith.constant 0 : index
    %c6 = arith.constant 6 : index
    %130 = memref.load %arg3[%c0_69, %c6] : memref<2x16xf32, #tpu.memory_space<smem>>
    %131 = vector.broadcast %130 : f32 to vector<24x66xf32>
    %132 = arith.mulf %0, %131 : vector<24x66xf32>
    %c1_70 = arith.constant 1 : index
    %c6_71 = arith.constant 6 : index
    %133 = memref.load %arg3[%c1_70, %c6_71] : memref<2x16xf32, #tpu.memory_space<smem>>
    %134 = vector.broadcast %133 : f32 to vector<24x66xf32>
    %135 = arith.mulf %1, %134 : vector<24x66xf32>
    %136 = arith.addf %132, %135 : vector<24x66xf32>
    %c0_72 = arith.constant 0 : index
    %c6_73 = arith.constant 6 : index
    %137 = memref.load %arg4[%c0_72, %c6_73] : memref<1x16xf32, #tpu.memory_space<smem>>
    %138 = vector.broadcast %137 : f32 to vector<24x66xf32>
    %139 = arith.addf %136, %138 : vector<24x66xf32>
    %cst_74 = arith.constant 0.000000e+00 : f32
    %140 = vector.broadcast %cst_74 : f32 to vector<24x66xf32>
    %141 = arith.maximumf %139, %140 : vector<24x66xf32>
    %c6_75 = arith.constant 6 : index
    %c0_76 = arith.constant 0 : index
    %142 = memref.load %arg5[%c6_75, %c0_76] : memref<16x2xf32, #tpu.memory_space<smem>>
    %143 = vector.broadcast %142 : f32 to vector<24x66xf32>
    %144 = arith.mulf %141, %143 : vector<24x66xf32>
    %145 = arith.addf %125, %144 : vector<24x66xf32>
    %c6_77 = arith.constant 6 : index
    %c1_78 = arith.constant 1 : index
    %146 = memref.load %arg5[%c6_77, %c1_78] : memref<16x2xf32, #tpu.memory_space<smem>>
    %147 = vector.broadcast %146 : f32 to vector<24x66xf32>
    %148 = arith.mulf %141, %147 : vector<24x66xf32>
    %149 = arith.addf %129, %148 : vector<24x66xf32>
    %c0_79 = arith.constant 0 : index
    %c7 = arith.constant 7 : index
    %150 = memref.load %arg3[%c0_79, %c7] : memref<2x16xf32, #tpu.memory_space<smem>>
    %151 = vector.broadcast %150 : f32 to vector<24x66xf32>
    %152 = arith.mulf %0, %151 : vector<24x66xf32>
    %c1_80 = arith.constant 1 : index
    %c7_81 = arith.constant 7 : index
    %153 = memref.load %arg3[%c1_80, %c7_81] : memref<2x16xf32, #tpu.memory_space<smem>>
    %154 = vector.broadcast %153 : f32 to vector<24x66xf32>
    %155 = arith.mulf %1, %154 : vector<24x66xf32>
    %156 = arith.addf %152, %155 : vector<24x66xf32>
    %c0_82 = arith.constant 0 : index
    %c7_83 = arith.constant 7 : index
    %157 = memref.load %arg4[%c0_82, %c7_83] : memref<1x16xf32, #tpu.memory_space<smem>>
    %158 = vector.broadcast %157 : f32 to vector<24x66xf32>
    %159 = arith.addf %156, %158 : vector<24x66xf32>
    %cst_84 = arith.constant 0.000000e+00 : f32
    %160 = vector.broadcast %cst_84 : f32 to vector<24x66xf32>
    %161 = arith.maximumf %159, %160 : vector<24x66xf32>
    %c7_85 = arith.constant 7 : index
    %c0_86 = arith.constant 0 : index
    %162 = memref.load %arg5[%c7_85, %c0_86] : memref<16x2xf32, #tpu.memory_space<smem>>
    %163 = vector.broadcast %162 : f32 to vector<24x66xf32>
    %164 = arith.mulf %161, %163 : vector<24x66xf32>
    %165 = arith.addf %145, %164 : vector<24x66xf32>
    %c7_87 = arith.constant 7 : index
    %c1_88 = arith.constant 1 : index
    %166 = memref.load %arg5[%c7_87, %c1_88] : memref<16x2xf32, #tpu.memory_space<smem>>
    %167 = vector.broadcast %166 : f32 to vector<24x66xf32>
    %168 = arith.mulf %161, %167 : vector<24x66xf32>
    %169 = arith.addf %149, %168 : vector<24x66xf32>
    %c0_89 = arith.constant 0 : index
    %c8 = arith.constant 8 : index
    %170 = memref.load %arg3[%c0_89, %c8] : memref<2x16xf32, #tpu.memory_space<smem>>
    %171 = vector.broadcast %170 : f32 to vector<24x66xf32>
    %172 = arith.mulf %0, %171 : vector<24x66xf32>
    %c1_90 = arith.constant 1 : index
    %c8_91 = arith.constant 8 : index
    %173 = memref.load %arg3[%c1_90, %c8_91] : memref<2x16xf32, #tpu.memory_space<smem>>
    %174 = vector.broadcast %173 : f32 to vector<24x66xf32>
    %175 = arith.mulf %1, %174 : vector<24x66xf32>
    %176 = arith.addf %172, %175 : vector<24x66xf32>
    %c0_92 = arith.constant 0 : index
    %c8_93 = arith.constant 8 : index
    %177 = memref.load %arg4[%c0_92, %c8_93] : memref<1x16xf32, #tpu.memory_space<smem>>
    %178 = vector.broadcast %177 : f32 to vector<24x66xf32>
    %179 = arith.addf %176, %178 : vector<24x66xf32>
    %cst_94 = arith.constant 0.000000e+00 : f32
    %180 = vector.broadcast %cst_94 : f32 to vector<24x66xf32>
    %181 = arith.maximumf %179, %180 : vector<24x66xf32>
    %c8_95 = arith.constant 8 : index
    %c0_96 = arith.constant 0 : index
    %182 = memref.load %arg5[%c8_95, %c0_96] : memref<16x2xf32, #tpu.memory_space<smem>>
    %183 = vector.broadcast %182 : f32 to vector<24x66xf32>
    %184 = arith.mulf %181, %183 : vector<24x66xf32>
    %185 = arith.addf %165, %184 : vector<24x66xf32>
    %c8_97 = arith.constant 8 : index
    %c1_98 = arith.constant 1 : index
    %186 = memref.load %arg5[%c8_97, %c1_98] : memref<16x2xf32, #tpu.memory_space<smem>>
    %187 = vector.broadcast %186 : f32 to vector<24x66xf32>
    %188 = arith.mulf %181, %187 : vector<24x66xf32>
    %189 = arith.addf %169, %188 : vector<24x66xf32>
    %c0_99 = arith.constant 0 : index
    %c9 = arith.constant 9 : index
    %190 = memref.load %arg3[%c0_99, %c9] : memref<2x16xf32, #tpu.memory_space<smem>>
    %191 = vector.broadcast %190 : f32 to vector<24x66xf32>
    %192 = arith.mulf %0, %191 : vector<24x66xf32>
    %c1_100 = arith.constant 1 : index
    %c9_101 = arith.constant 9 : index
    %193 = memref.load %arg3[%c1_100, %c9_101] : memref<2x16xf32, #tpu.memory_space<smem>>
    %194 = vector.broadcast %193 : f32 to vector<24x66xf32>
    %195 = arith.mulf %1, %194 : vector<24x66xf32>
    %196 = arith.addf %192, %195 : vector<24x66xf32>
    %c0_102 = arith.constant 0 : index
    %c9_103 = arith.constant 9 : index
    %197 = memref.load %arg4[%c0_102, %c9_103] : memref<1x16xf32, #tpu.memory_space<smem>>
    %198 = vector.broadcast %197 : f32 to vector<24x66xf32>
    %199 = arith.addf %196, %198 : vector<24x66xf32>
    %cst_104 = arith.constant 0.000000e+00 : f32
    %200 = vector.broadcast %cst_104 : f32 to vector<24x66xf32>
    %201 = arith.maximumf %199, %200 : vector<24x66xf32>
    %c9_105 = arith.constant 9 : index
    %c0_106 = arith.constant 0 : index
    %202 = memref.load %arg5[%c9_105, %c0_106] : memref<16x2xf32, #tpu.memory_space<smem>>
    %203 = vector.broadcast %202 : f32 to vector<24x66xf32>
    %204 = arith.mulf %201, %203 : vector<24x66xf32>
    %205 = arith.addf %185, %204 : vector<24x66xf32>
    %c9_107 = arith.constant 9 : index
    %c1_108 = arith.constant 1 : index
    %206 = memref.load %arg5[%c9_107, %c1_108] : memref<16x2xf32, #tpu.memory_space<smem>>
    %207 = vector.broadcast %206 : f32 to vector<24x66xf32>
    %208 = arith.mulf %201, %207 : vector<24x66xf32>
    %209 = arith.addf %189, %208 : vector<24x66xf32>
    %c0_109 = arith.constant 0 : index
    %c10 = arith.constant 10 : index
    %210 = memref.load %arg3[%c0_109, %c10] : memref<2x16xf32, #tpu.memory_space<smem>>
    %211 = vector.broadcast %210 : f32 to vector<24x66xf32>
    %212 = arith.mulf %0, %211 : vector<24x66xf32>
    %c1_110 = arith.constant 1 : index
    %c10_111 = arith.constant 10 : index
    %213 = memref.load %arg3[%c1_110, %c10_111] : memref<2x16xf32, #tpu.memory_space<smem>>
    %214 = vector.broadcast %213 : f32 to vector<24x66xf32>
    %215 = arith.mulf %1, %214 : vector<24x66xf32>
    %216 = arith.addf %212, %215 : vector<24x66xf32>
    %c0_112 = arith.constant 0 : index
    %c10_113 = arith.constant 10 : index
    %217 = memref.load %arg4[%c0_112, %c10_113] : memref<1x16xf32, #tpu.memory_space<smem>>
    %218 = vector.broadcast %217 : f32 to vector<24x66xf32>
    %219 = arith.addf %216, %218 : vector<24x66xf32>
    %cst_114 = arith.constant 0.000000e+00 : f32
    %220 = vector.broadcast %cst_114 : f32 to vector<24x66xf32>
    %221 = arith.maximumf %219, %220 : vector<24x66xf32>
    %c10_115 = arith.constant 10 : index
    %c0_116 = arith.constant 0 : index
    %222 = memref.load %arg5[%c10_115, %c0_116] : memref<16x2xf32, #tpu.memory_space<smem>>
    %223 = vector.broadcast %222 : f32 to vector<24x66xf32>
    %224 = arith.mulf %221, %223 : vector<24x66xf32>
    %225 = arith.addf %205, %224 : vector<24x66xf32>
    %c10_117 = arith.constant 10 : index
    %c1_118 = arith.constant 1 : index
    %226 = memref.load %arg5[%c10_117, %c1_118] : memref<16x2xf32, #tpu.memory_space<smem>>
    %227 = vector.broadcast %226 : f32 to vector<24x66xf32>
    %228 = arith.mulf %221, %227 : vector<24x66xf32>
    %229 = arith.addf %209, %228 : vector<24x66xf32>
    %c0_119 = arith.constant 0 : index
    %c11 = arith.constant 11 : index
    %230 = memref.load %arg3[%c0_119, %c11] : memref<2x16xf32, #tpu.memory_space<smem>>
    %231 = vector.broadcast %230 : f32 to vector<24x66xf32>
    %232 = arith.mulf %0, %231 : vector<24x66xf32>
    %c1_120 = arith.constant 1 : index
    %c11_121 = arith.constant 11 : index
    %233 = memref.load %arg3[%c1_120, %c11_121] : memref<2x16xf32, #tpu.memory_space<smem>>
    %234 = vector.broadcast %233 : f32 to vector<24x66xf32>
    %235 = arith.mulf %1, %234 : vector<24x66xf32>
    %236 = arith.addf %232, %235 : vector<24x66xf32>
    %c0_122 = arith.constant 0 : index
    %c11_123 = arith.constant 11 : index
    %237 = memref.load %arg4[%c0_122, %c11_123] : memref<1x16xf32, #tpu.memory_space<smem>>
    %238 = vector.broadcast %237 : f32 to vector<24x66xf32>
    %239 = arith.addf %236, %238 : vector<24x66xf32>
    %cst_124 = arith.constant 0.000000e+00 : f32
    %240 = vector.broadcast %cst_124 : f32 to vector<24x66xf32>
    %241 = arith.maximumf %239, %240 : vector<24x66xf32>
    %c11_125 = arith.constant 11 : index
    %c0_126 = arith.constant 0 : index
    %242 = memref.load %arg5[%c11_125, %c0_126] : memref<16x2xf32, #tpu.memory_space<smem>>
    %243 = vector.broadcast %242 : f32 to vector<24x66xf32>
    %244 = arith.mulf %241, %243 : vector<24x66xf32>
    %245 = arith.addf %225, %244 : vector<24x66xf32>
    %c11_127 = arith.constant 11 : index
    %c1_128 = arith.constant 1 : index
    %246 = memref.load %arg5[%c11_127, %c1_128] : memref<16x2xf32, #tpu.memory_space<smem>>
    %247 = vector.broadcast %246 : f32 to vector<24x66xf32>
    %248 = arith.mulf %241, %247 : vector<24x66xf32>
    %249 = arith.addf %229, %248 : vector<24x66xf32>
    %c0_129 = arith.constant 0 : index
    %c12 = arith.constant 12 : index
    %250 = memref.load %arg3[%c0_129, %c12] : memref<2x16xf32, #tpu.memory_space<smem>>
    %251 = vector.broadcast %250 : f32 to vector<24x66xf32>
    %252 = arith.mulf %0, %251 : vector<24x66xf32>
    %c1_130 = arith.constant 1 : index
    %c12_131 = arith.constant 12 : index
    %253 = memref.load %arg3[%c1_130, %c12_131] : memref<2x16xf32, #tpu.memory_space<smem>>
    %254 = vector.broadcast %253 : f32 to vector<24x66xf32>
    %255 = arith.mulf %1, %254 : vector<24x66xf32>
    %256 = arith.addf %252, %255 : vector<24x66xf32>
    %c0_132 = arith.constant 0 : index
    %c12_133 = arith.constant 12 : index
    %257 = memref.load %arg4[%c0_132, %c12_133] : memref<1x16xf32, #tpu.memory_space<smem>>
    %258 = vector.broadcast %257 : f32 to vector<24x66xf32>
    %259 = arith.addf %256, %258 : vector<24x66xf32>
    %cst_134 = arith.constant 0.000000e+00 : f32
    %260 = vector.broadcast %cst_134 : f32 to vector<24x66xf32>
    %261 = arith.maximumf %259, %260 : vector<24x66xf32>
    %c12_135 = arith.constant 12 : index
    %c0_136 = arith.constant 0 : index
    %262 = memref.load %arg5[%c12_135, %c0_136] : memref<16x2xf32, #tpu.memory_space<smem>>
    %263 = vector.broadcast %262 : f32 to vector<24x66xf32>
    %264 = arith.mulf %261, %263 : vector<24x66xf32>
    %265 = arith.addf %245, %264 : vector<24x66xf32>
    %c12_137 = arith.constant 12 : index
    %c1_138 = arith.constant 1 : index
    %266 = memref.load %arg5[%c12_137, %c1_138] : memref<16x2xf32, #tpu.memory_space<smem>>
    %267 = vector.broadcast %266 : f32 to vector<24x66xf32>
    %268 = arith.mulf %261, %267 : vector<24x66xf32>
    %269 = arith.addf %249, %268 : vector<24x66xf32>
    %c0_139 = arith.constant 0 : index
    %c13 = arith.constant 13 : index
    %270 = memref.load %arg3[%c0_139, %c13] : memref<2x16xf32, #tpu.memory_space<smem>>
    %271 = vector.broadcast %270 : f32 to vector<24x66xf32>
    %272 = arith.mulf %0, %271 : vector<24x66xf32>
    %c1_140 = arith.constant 1 : index
    %c13_141 = arith.constant 13 : index
    %273 = memref.load %arg3[%c1_140, %c13_141] : memref<2x16xf32, #tpu.memory_space<smem>>
    %274 = vector.broadcast %273 : f32 to vector<24x66xf32>
    %275 = arith.mulf %1, %274 : vector<24x66xf32>
    %276 = arith.addf %272, %275 : vector<24x66xf32>
    %c0_142 = arith.constant 0 : index
    %c13_143 = arith.constant 13 : index
    %277 = memref.load %arg4[%c0_142, %c13_143] : memref<1x16xf32, #tpu.memory_space<smem>>
    %278 = vector.broadcast %277 : f32 to vector<24x66xf32>
    %279 = arith.addf %276, %278 : vector<24x66xf32>
    %cst_144 = arith.constant 0.000000e+00 : f32
    %280 = vector.broadcast %cst_144 : f32 to vector<24x66xf32>
    %281 = arith.maximumf %279, %280 : vector<24x66xf32>
    %c13_145 = arith.constant 13 : index
    %c0_146 = arith.constant 0 : index
    %282 = memref.load %arg5[%c13_145, %c0_146] : memref<16x2xf32, #tpu.memory_space<smem>>
    %283 = vector.broadcast %282 : f32 to vector<24x66xf32>
    %284 = arith.mulf %281, %283 : vector<24x66xf32>
    %285 = arith.addf %265, %284 : vector<24x66xf32>
    %c13_147 = arith.constant 13 : index
    %c1_148 = arith.constant 1 : index
    %286 = memref.load %arg5[%c13_147, %c1_148] : memref<16x2xf32, #tpu.memory_space<smem>>
    %287 = vector.broadcast %286 : f32 to vector<24x66xf32>
    %288 = arith.mulf %281, %287 : vector<24x66xf32>
    %289 = arith.addf %269, %288 : vector<24x66xf32>
    %c0_149 = arith.constant 0 : index
    %c14 = arith.constant 14 : index
    %290 = memref.load %arg3[%c0_149, %c14] : memref<2x16xf32, #tpu.memory_space<smem>>
    %291 = vector.broadcast %290 : f32 to vector<24x66xf32>
    %292 = arith.mulf %0, %291 : vector<24x66xf32>
    %c1_150 = arith.constant 1 : index
    %c14_151 = arith.constant 14 : index
    %293 = memref.load %arg3[%c1_150, %c14_151] : memref<2x16xf32, #tpu.memory_space<smem>>
    %294 = vector.broadcast %293 : f32 to vector<24x66xf32>
    %295 = arith.mulf %1, %294 : vector<24x66xf32>
    %296 = arith.addf %292, %295 : vector<24x66xf32>
    %c0_152 = arith.constant 0 : index
    %c14_153 = arith.constant 14 : index
    %297 = memref.load %arg4[%c0_152, %c14_153] : memref<1x16xf32, #tpu.memory_space<smem>>
    %298 = vector.broadcast %297 : f32 to vector<24x66xf32>
    %299 = arith.addf %296, %298 : vector<24x66xf32>
    %cst_154 = arith.constant 0.000000e+00 : f32
    %300 = vector.broadcast %cst_154 : f32 to vector<24x66xf32>
    %301 = arith.maximumf %299, %300 : vector<24x66xf32>
    %c14_155 = arith.constant 14 : index
    %c0_156 = arith.constant 0 : index
    %302 = memref.load %arg5[%c14_155, %c0_156] : memref<16x2xf32, #tpu.memory_space<smem>>
    %303 = vector.broadcast %302 : f32 to vector<24x66xf32>
    %304 = arith.mulf %301, %303 : vector<24x66xf32>
    %305 = arith.addf %285, %304 : vector<24x66xf32>
    %c14_157 = arith.constant 14 : index
    %c1_158 = arith.constant 1 : index
    %306 = memref.load %arg5[%c14_157, %c1_158] : memref<16x2xf32, #tpu.memory_space<smem>>
    %307 = vector.broadcast %306 : f32 to vector<24x66xf32>
    %308 = arith.mulf %301, %307 : vector<24x66xf32>
    %309 = arith.addf %289, %308 : vector<24x66xf32>
    %c0_159 = arith.constant 0 : index
    %c15 = arith.constant 15 : index
    %310 = memref.load %arg3[%c0_159, %c15] : memref<2x16xf32, #tpu.memory_space<smem>>
    %311 = vector.broadcast %310 : f32 to vector<24x66xf32>
    %312 = arith.mulf %0, %311 : vector<24x66xf32>
    %c1_160 = arith.constant 1 : index
    %c15_161 = arith.constant 15 : index
    %313 = memref.load %arg3[%c1_160, %c15_161] : memref<2x16xf32, #tpu.memory_space<smem>>
    %314 = vector.broadcast %313 : f32 to vector<24x66xf32>
    %315 = arith.mulf %1, %314 : vector<24x66xf32>
    %316 = arith.addf %312, %315 : vector<24x66xf32>
    %c0_162 = arith.constant 0 : index
    %c15_163 = arith.constant 15 : index
    %317 = memref.load %arg4[%c0_162, %c15_163] : memref<1x16xf32, #tpu.memory_space<smem>>
    %318 = vector.broadcast %317 : f32 to vector<24x66xf32>
    %319 = arith.addf %316, %318 : vector<24x66xf32>
    %cst_164 = arith.constant 0.000000e+00 : f32
    %320 = vector.broadcast %cst_164 : f32 to vector<24x66xf32>
    %321 = arith.maximumf %319, %320 : vector<24x66xf32>
    %c15_165 = arith.constant 15 : index
    %c0_166 = arith.constant 0 : index
    %322 = memref.load %arg5[%c15_165, %c0_166] : memref<16x2xf32, #tpu.memory_space<smem>>
    %323 = vector.broadcast %322 : f32 to vector<24x66xf32>
    %324 = arith.mulf %321, %323 : vector<24x66xf32>
    %325 = arith.addf %305, %324 : vector<24x66xf32>
    %c15_167 = arith.constant 15 : index
    %c1_168 = arith.constant 1 : index
    %326 = memref.load %arg5[%c15_167, %c1_168] : memref<16x2xf32, #tpu.memory_space<smem>>
    %327 = vector.broadcast %326 : f32 to vector<24x66xf32>
    %328 = arith.mulf %321, %327 : vector<24x66xf32>
    %329 = arith.addf %309, %328 : vector<24x66xf32>
    %330 = arith.mulf %0, %325 : vector<24x66xf32>
    %331 = arith.mulf %1, %329 : vector<24x66xf32>
    %332 = arith.subf %330, %331 : vector<24x66xf32>
    %333 = arith.truncf %332 : vector<24x66xf32> to vector<24x66xbf16>
    %334 = arith.mulf %0, %329 : vector<24x66xf32>
    %335 = arith.mulf %1, %325 : vector<24x66xf32>
    %336 = arith.addf %334, %335 : vector<24x66xf32>
    %337 = arith.truncf %336 : vector<24x66xf32> to vector<24x66xbf16>
    %c0_169 = arith.constant 0 : index
    %c0_170 = arith.constant 0 : index
    %338 = vector.load %arg7[%c0_169, %c0_170] : memref<66x128xbf16, #tpu.memory_space<vmem>>, vector<66x128xbf16>
    %cst_171 = arith.constant dense<0.000000e+00> : vector<24x128xf32>
    %339 = tpu.matmul %333, %338, %cst_171 {dimension_numbers = #tpu.dot_dimension_numbers<[1], [0], [0], [1], [0, 0, 1, 1], [], []>} : vector<24x66xbf16>, vector<66x128xbf16>, vector<24x128xf32> -> vector<24x128xf32>
    %c0_172 = arith.constant 0 : index
    %c0_173 = arith.constant 0 : index
    %340 = vector.load %arg8[%c0_172, %c0_173] : memref<66x128xbf16, #tpu.memory_space<vmem>>, vector<66x128xbf16>
    %cst_174 = arith.constant dense<0.000000e+00> : vector<24x128xf32>
    %341 = tpu.matmul %337, %340, %cst_174 {dimension_numbers = #tpu.dot_dimension_numbers<[1], [0], [0], [1], [0, 0, 1, 1], [], []>} : vector<24x66xbf16>, vector<66x128xbf16>, vector<24x128xf32> -> vector<24x128xf32>
    %342 = arith.addf %339, %341 : vector<24x128xf32>
    %c0_175 = arith.constant 0 : index
    %c0_176 = arith.constant 0 : index
    %343 = vector.load %arg9[%c0_175, %c0_176] : memref<24x128xf32, #tpu.memory_space<vmem>>, vector<24x128xf32>
    tpu.vector_store %arg9[%c0_175, %c0_176], %342 {strides = array<i32>} : memref<24x128xf32, #tpu.memory_space<vmem>>, vector<24x128xf32>,
    return
  }
  func.func @transform_0(%arg0: i32) -> (i32, i32) {
    %c0_i32 = arith.constant 0 : i32
    %c0_i32_0 = arith.constant 0 : i32
    return %arg0, %c0_i32 : i32, i32
  }
  func.func @transform_1(%arg0: i32) -> (i32, i32) {
    %c0_i32 = arith.constant 0 : i32
    %c0_i32_0 = arith.constant 0 : i32
    return %arg0, %c0_i32 : i32, i32
  }
  func.func @transform_2(%arg0: i32) -> (i32, i32) {
    %c0_i32 = arith.constant 0 : i32
    %c0_i32_0 = arith.constant 0 : i32
    %c0_i32_1 = arith.constant 0 : i32
    return %c0_i32, %c0_i32_0 : i32, i32
  }
  func.func @transform_3(%arg0: i32) -> (i32, i32) {
    %c0_i32 = arith.constant 0 : i32
    %c0_i32_0 = arith.constant 0 : i32
    %c0_i32_1 = arith.constant 0 : i32
    return %c0_i32, %c0_i32_0 : i32, i32
  }
  func.func @transform_4(%arg0: i32) -> (i32, i32) {
    %c0_i32 = arith.constant 0 : i32
    %c0_i32_0 = arith.constant 0 : i32
    %c0_i32_1 = arith.constant 0 : i32
    return %c0_i32, %c0_i32_0 : i32, i32
  }
  func.func @transform_5(%arg0: i32) -> (i32, i32) {
    %c0_i32 = arith.constant 0 : i32
    %c0_i32_0 = arith.constant 0 : i32
    %c0_i32_1 = arith.constant 0 : i32
    return %c0_i32, %c0_i32_0 : i32, i32
  }
  func.func @transform_6(%arg0: i32) -> (i32, i32) {
    %c0_i32 = arith.constant 0 : i32
    %c0_i32_0 = arith.constant 0 : i32
    %c0_i32_1 = arith.constant 0 : i32
    return %c0_i32, %c0_i32_0 : i32, i32
  }
  func.func @transform_7(%arg0: i32) -> (i32, i32) {
    %c0_i32 = arith.constant 0 : i32
    %c0_i32_0 = arith.constant 0 : i32
    %c0_i32_1 = arith.constant 0 : i32
    return %c0_i32, %c0_i32_0 : i32, i32
  }
  func.func @transform_8(%arg0: i32) -> (i32, i32) {
    %c0_i32 = arith.constant 0 : i32
    %c0_i32_0 = arith.constant 0 : i32
    return %arg0, %c0_i32 : i32, i32
  }
}

module attributes {stable_mosaic.version = 11 : i64} {
  func.func @_tasnet_kernel(%arg0: i32, %arg1: memref<64x16xf32, #tpu.memory_space<vmem>>, %arg2: memref<16x64xbf16, #tpu.memory_space<vmem>>, %arg3: memref<1x64xf32, #tpu.memory_space<vmem>>, %arg4: memref<64x32xbf16, #tpu.memory_space<vmem>>, %arg5: memref<1x32xf32, #tpu.memory_space<vmem>>, %arg6: memref<4x32x64xbf16, #tpu.memory_space<vmem>>, %arg7: memref<4x1x64xf32, #tpu.memory_space<vmem>>, %arg8: memref<4x64x32xbf16, #tpu.memory_space<vmem>>, %arg9: memref<4x1x32xf32, #tpu.memory_space<vmem>>, %arg10: memref<32x128xbf16, #tpu.memory_space<vmem>>, %arg11: memref<1x128xf32, #tpu.memory_space<vmem>>, %arg12: memref<64x128xbf16, #tpu.memory_space<vmem>>, %arg13: memref<128x32xbf16, #tpu.memory_space<vmem>>, %arg14: memref<1x32xf32, #tpu.memory_space<vmem>>, %arg15: memref<64x32xf32, #tpu.memory_space<vmem>>) attributes {dimension_semantics = [#tpu.dimension_semantics<parallel>], iteration_bounds = array<i64: 1>, scalar_prefetch = 0 : i64, scratch_operands = 0 : i64, tpu.core_type = #tpu.core_type<tc>, window_params = [{transform_indices = @transform_0, window_bounds = array<i64: 64, 16>}, {pipeline_mode = #tpu.pipeline_mode<synchronous>, transform_indices = @transform_1, window_bounds = array<i64: 16, 64>}, {pipeline_mode = #tpu.pipeline_mode<synchronous>, transform_indices = @transform_2, window_bounds = array<i64: 1, 64>}, {pipeline_mode = #tpu.pipeline_mode<synchronous>, transform_indices = @transform_3, window_bounds = array<i64: 64, 32>}, {pipeline_mode = #tpu.pipeline_mode<synchronous>, transform_indices = @transform_4, window_bounds = array<i64: 1, 32>}, {pipeline_mode = #tpu.pipeline_mode<synchronous>, transform_indices = @transform_5, window_bounds = array<i64: 4, 32, 64>}, {pipeline_mode = #tpu.pipeline_mode<synchronous>, transform_indices = @transform_6, window_bounds = array<i64: 4, 1, 64>}, {pipeline_mode = #tpu.pipeline_mode<synchronous>, transform_indices = @transform_7, window_bounds = array<i64: 4, 64, 32>}, {pipeline_mode = #tpu.pipeline_mode<synchronous>, transform_indices = @transform_8, window_bounds = array<i64: 4, 1, 32>}, {pipeline_mode = #tpu.pipeline_mode<synchronous>, transform_indices = @transform_9, window_bounds = array<i64: 32, 128>}, {pipeline_mode = #tpu.pipeline_mode<synchronous>, transform_indices = @transform_10, window_bounds = array<i64: 1, 128>}, {pipeline_mode = #tpu.pipeline_mode<synchronous>, transform_indices = @transform_11, window_bounds = array<i64: 64, 128>}, {pipeline_mode = #tpu.pipeline_mode<synchronous>, transform_indices = @transform_12, window_bounds = array<i64: 128, 32>}, {pipeline_mode = #tpu.pipeline_mode<synchronous>, transform_indices = @transform_13, window_bounds = array<i64: 1, 32>}, {transform_indices = @transform_14, window_bounds = array<i64: 64, 32>}]} {
    %c0 = arith.constant 0 : index
    %c0_0 = arith.constant 0 : index
    %0 = vector.load %arg1[%c0, %c0_0] : memref<64x16xf32, #tpu.memory_space<vmem>>, vector<64x16xf32>
    %1 = arith.truncf %0 : vector<64x16xf32> to vector<64x16xbf16>
    %c0_1 = arith.constant 0 : index
    %c0_2 = arith.constant 0 : index
    %2 = vector.load %arg2[%c0_1, %c0_2] : memref<16x64xbf16, #tpu.memory_space<vmem>>, vector<16x64xbf16>
    %cst = arith.constant dense<0.000000e+00> : vector<64x64xf32>
    %3 = tpu.matmul %1, %2, %cst {dimension_numbers = #tpu.dot_dimension_numbers<[1], [0], [0], [1], [0, 0, 1, 1], [], []>} : vector<64x16xbf16>, vector<16x64xbf16>, vector<64x64xf32> -> vector<64x64xf32>
    %c0_3 = arith.constant 0 : index
    %c0_4 = arith.constant 0 : index
    %4 = vector.load %arg3[%c0_3, %c0_4] : memref<1x64xf32, #tpu.memory_space<vmem>>, vector<1x64xf32>
    %5 = vector.broadcast %4 : vector<1x64xf32> to vector<64x64xf32>
    %6 = arith.addf %3, %5 : vector<64x64xf32>
    %cst_5 = arith.constant 0.000000e+00 : f32
    %7 = vector.broadcast %cst_5 : f32 to vector<64x64xf32>
    %8 = arith.maximumf %6, %7 : vector<64x64xf32>
    %9 = arith.truncf %8 : vector<64x64xf32> to vector<64x64xbf16>
    %c0_6 = arith.constant 0 : index
    %c0_7 = arith.constant 0 : index
    %10 = vector.load %arg4[%c0_6, %c0_7] : memref<64x32xbf16, #tpu.memory_space<vmem>>, vector<64x32xbf16>
    %cst_8 = arith.constant dense<0.000000e+00> : vector<64x32xf32>
    %11 = tpu.matmul %9, %10, %cst_8 {dimension_numbers = #tpu.dot_dimension_numbers<[1], [0], [0], [1], [0, 0, 1, 1], [], []>} : vector<64x64xbf16>, vector<64x32xbf16>, vector<64x32xf32> -> vector<64x32xf32>
    %c0_9 = arith.constant 0 : index
    %c0_10 = arith.constant 0 : index
    %12 = vector.load %arg5[%c0_9, %c0_10] : memref<1x32xf32, #tpu.memory_space<vmem>>, vector<1x32xf32>
    %13 = vector.broadcast %12 : vector<1x32xf32> to vector<64x32xf32>
    %14 = arith.addf %11, %13 : vector<64x32xf32>
    %c0_i32 = arith.constant 0 : i32
    %c4_i32 = arith.constant 4 : i32
    %15 = arith.addi %c0_i32, %c4_i32 : i32
    %c1_i32 = arith.constant 1 : i32
    %16 = scf.for %arg16 = %c0_i32 to %15 step %c1_i32 iter_args(%arg17 = %14) -> (vector<64x32xf32>)  : i32 {
      %39 = arith.truncf %arg17 : vector<64x32xf32> to vector<64x32xbf16>
      %40 = arith.index_cast %arg16 : i32 to index
      %c0_28 = arith.constant 0 : index
      %c0_29 = arith.constant 0 : index
      %41 = vector.load %arg6[%40, %c0_28, %c0_29] : memref<4x32x64xbf16, #tpu.memory_space<vmem>>, vector<1x32x64xbf16>
      %42 = vector.shape_cast %41 : vector<1x32x64xbf16> to vector<32x64xbf16>
      %cst_30 = arith.constant dense<0.000000e+00> : vector<64x64xf32>
      %43 = tpu.matmul %39, %42, %cst_30 {dimension_numbers = #tpu.dot_dimension_numbers<[1], [0], [0], [1], [0, 0, 1, 1], [], []>} : vector<64x32xbf16>, vector<32x64xbf16>, vector<64x64xf32> -> vector<64x64xf32>
      %44 = arith.index_cast %arg16 : i32 to index
      %c0_31 = arith.constant 0 : index
      %c0_32 = arith.constant 0 : index
      %45 = vector.load %arg7[%44, %c0_31, %c0_32] : memref<4x1x64xf32, #tpu.memory_space<vmem>>, vector<1x1x64xf32>
      %46 = vector.shape_cast %45 : vector<1x1x64xf32> to vector<1x64xf32>
      %47 = vector.broadcast %46 : vector<1x64xf32> to vector<64x64xf32>
      %48 = arith.addf %43, %47 : vector<64x64xf32>
      %cst_33 = arith.constant 0.000000e+00 : f32
      %49 = vector.broadcast %cst_33 : f32 to vector<64x64xf32>
      %50 = arith.maximumf %48, %49 : vector<64x64xf32>
      %51 = arith.truncf %50 : vector<64x64xf32> to vector<64x64xbf16>
      %52 = arith.index_cast %arg16 : i32 to index
      %c0_34 = arith.constant 0 : index
      %c0_35 = arith.constant 0 : index
      %53 = vector.load %arg8[%52, %c0_34, %c0_35] : memref<4x64x32xbf16, #tpu.memory_space<vmem>>, vector<1x64x32xbf16>
      %54 = vector.shape_cast %53 : vector<1x64x32xbf16> to vector<64x32xbf16>
      %cst_36 = arith.constant dense<0.000000e+00> : vector<64x32xf32>
      %55 = tpu.matmul %51, %54, %cst_36 {dimension_numbers = #tpu.dot_dimension_numbers<[1], [0], [0], [1], [0, 0, 1, 1], [], []>} : vector<64x64xbf16>, vector<64x32xbf16>, vector<64x32xf32> -> vector<64x32xf32>
      %56 = arith.addf %arg17, %55 : vector<64x32xf32>
      %57 = arith.index_cast %arg16 : i32 to index
      %c0_37 = arith.constant 0 : index
      %c0_38 = arith.constant 0 : index
      %58 = vector.load %arg9[%57, %c0_37, %c0_38] : memref<4x1x32xf32, #tpu.memory_space<vmem>>, vector<1x1x32xf32>
      %59 = vector.shape_cast %58 : vector<1x1x32xf32> to vector<1x32xf32>
      %60 = vector.broadcast %59 : vector<1x32xf32> to vector<64x32xf32>
      %61 = arith.addf %56, %60 : vector<64x32xf32>
      scf.yield %61 : vector<64x32xf32>
    }
    %c4_i32_11 = arith.constant 4 : i32
    %17 = arith.truncf %16 : vector<64x32xf32> to vector<64x32xbf16>
    %c0_12 = arith.constant 0 : index
    %c0_13 = arith.constant 0 : index
    %18 = vector.load %arg10[%c0_12, %c0_13] : memref<32x128xbf16, #tpu.memory_space<vmem>>, vector<32x128xbf16>
    %cst_14 = arith.constant dense<0.000000e+00> : vector<64x128xf32>
    %19 = tpu.matmul %17, %18, %cst_14 {dimension_numbers = #tpu.dot_dimension_numbers<[1], [0], [0], [1], [0, 0, 1, 1], [], []>} : vector<64x32xbf16>, vector<32x128xbf16>, vector<64x128xf32> -> vector<64x128xf32>
    %c0_15 = arith.constant 0 : index
    %c0_16 = arith.constant 0 : index
    %20 = vector.load %arg11[%c0_15, %c0_16] : memref<1x128xf32, #tpu.memory_space<vmem>>, vector<1x128xf32>
    %21 = vector.broadcast %20 : vector<1x128xf32> to vector<64x128xf32>
    %22 = arith.addf %19, %21 : vector<64x128xf32>
    %23 = arith.negf %22 : vector<64x128xf32>
    %24 = math.exp %23 : vector<64x128xf32>
    %cst_17 = arith.constant 1.000000e+00 : f32
    %25 = vector.broadcast %cst_17 : f32 to vector<64x128xf32>
    %26 = arith.addf %25, %24 : vector<64x128xf32>
    %27 = arith.divf %25, %26 : vector<64x128xf32>
    %28 = arith.truncf %8 : vector<64x64xf32> to vector<64x64xbf16>
    %c0_18 = arith.constant 0 : index
    %c0_19 = arith.constant 0 : index
    %29 = vector.load %arg12[%c0_18, %c0_19] : memref<64x128xbf16, #tpu.memory_space<vmem>>, vector<64x128xbf16>
    %cst_20 = arith.constant dense<0.000000e+00> : vector<64x128xf32>
    %30 = tpu.matmul %28, %29, %cst_20 {dimension_numbers = #tpu.dot_dimension_numbers<[1], [0], [0], [1], [0, 0, 1, 1], [], []>} : vector<64x64xbf16>, vector<64x128xbf16>, vector<64x128xf32> -> vector<64x128xf32>
    %31 = arith.mulf %30, %27 : vector<64x128xf32>
    %32 = arith.truncf %31 : vector<64x128xf32> to vector<64x128xbf16>
    %c0_21 = arith.constant 0 : index
    %c0_22 = arith.constant 0 : index
    %33 = vector.load %arg13[%c0_21, %c0_22] : memref<128x32xbf16, #tpu.memory_space<vmem>>, vector<128x32xbf16>
    %cst_23 = arith.constant dense<0.000000e+00> : vector<64x32xf32>
    %34 = tpu.matmul %32, %33, %cst_23 {dimension_numbers = #tpu.dot_dimension_numbers<[1], [0], [0], [1], [0, 0, 1, 1], [], []>} : vector<64x128xbf16>, vector<128x32xbf16>, vector<64x32xf32> -> vector<64x32xf32>
    %c0_24 = arith.constant 0 : index
    %c0_25 = arith.constant 0 : index
    %35 = vector.load %arg14[%c0_24, %c0_25] : memref<1x32xf32, #tpu.memory_space<vmem>>, vector<1x32xf32>
    %36 = vector.broadcast %35 : vector<1x32xf32> to vector<64x32xf32>
    %37 = arith.addf %34, %36 : vector<64x32xf32>
    %c0_26 = arith.constant 0 : index
    %c0_27 = arith.constant 0 : index
    %38 = vector.load %arg15[%c0_26, %c0_27] : memref<64x32xf32, #tpu.memory_space<vmem>>, vector<64x32xf32>
    tpu.vector_store %arg15[%c0_26, %c0_27], %37 {strides = array<i32>} : memref<64x32xf32, #tpu.memory_space<vmem>>, vector<64x32xf32>,
    return
  }
  func.func @transform_0(%arg0: i32) -> (i32, i32) {
    %c0_i32 = arith.constant 0 : i32
    %c0_i32_0 = arith.constant 0 : i32
    return %arg0, %c0_i32 : i32, i32
  }
  func.func @transform_1(%arg0: i32) -> (i32, i32) {
    %c0_i32 = arith.constant 0 : i32
    %c0_i32_0 = arith.constant 0 : i32
    %c0_i32_1 = arith.constant 0 : i32
    return %c0_i32, %c0_i32_0 : i32, i32
  }
  func.func @transform_2(%arg0: i32) -> (i32, i32) {
    %c0_i32 = arith.constant 0 : i32
    %c0_i32_0 = arith.constant 0 : i32
    %c0_i32_1 = arith.constant 0 : i32
    return %c0_i32, %c0_i32_0 : i32, i32
  }
  func.func @transform_3(%arg0: i32) -> (i32, i32) {
    %c0_i32 = arith.constant 0 : i32
    %c0_i32_0 = arith.constant 0 : i32
    %c0_i32_1 = arith.constant 0 : i32
    return %c0_i32, %c0_i32_0 : i32, i32
  }
  func.func @transform_4(%arg0: i32) -> (i32, i32) {
    %c0_i32 = arith.constant 0 : i32
    %c0_i32_0 = arith.constant 0 : i32
    %c0_i32_1 = arith.constant 0 : i32
    return %c0_i32, %c0_i32_0 : i32, i32
  }
  func.func @transform_5(%arg0: i32) -> (i32, i32, i32) {
    %c0_i32 = arith.constant 0 : i32
    %c0_i32_0 = arith.constant 0 : i32
    %c0_i32_1 = arith.constant 0 : i32
    %c0_i32_2 = arith.constant 0 : i32
    return %c0_i32, %c0_i32_0, %c0_i32_1 : i32, i32, i32
  }
  func.func @transform_6(%arg0: i32) -> (i32, i32, i32) {
    %c0_i32 = arith.constant 0 : i32
    %c0_i32_0 = arith.constant 0 : i32
    %c0_i32_1 = arith.constant 0 : i32
    %c0_i32_2 = arith.constant 0 : i32
    return %c0_i32, %c0_i32_0, %c0_i32_1 : i32, i32, i32
  }
  func.func @transform_7(%arg0: i32) -> (i32, i32, i32) {
    %c0_i32 = arith.constant 0 : i32
    %c0_i32_0 = arith.constant 0 : i32
    %c0_i32_1 = arith.constant 0 : i32
    %c0_i32_2 = arith.constant 0 : i32
    return %c0_i32, %c0_i32_0, %c0_i32_1 : i32, i32, i32
  }
  func.func @transform_8(%arg0: i32) -> (i32, i32, i32) {
    %c0_i32 = arith.constant 0 : i32
    %c0_i32_0 = arith.constant 0 : i32
    %c0_i32_1 = arith.constant 0 : i32
    %c0_i32_2 = arith.constant 0 : i32
    return %c0_i32, %c0_i32_0, %c0_i32_1 : i32, i32, i32
  }
  func.func @transform_9(%arg0: i32) -> (i32, i32) {
    %c0_i32 = arith.constant 0 : i32
    %c0_i32_0 = arith.constant 0 : i32
    %c0_i32_1 = arith.constant 0 : i32
    return %c0_i32, %c0_i32_0 : i32, i32
  }
  func.func @transform_10(%arg0: i32) -> (i32, i32) {
    %c0_i32 = arith.constant 0 : i32
    %c0_i32_0 = arith.constant 0 : i32
    %c0_i32_1 = arith.constant 0 : i32
    return %c0_i32, %c0_i32_0 : i32, i32
  }
  func.func @transform_11(%arg0: i32) -> (i32, i32) {
    %c0_i32 = arith.constant 0 : i32
    %c0_i32_0 = arith.constant 0 : i32
    %c0_i32_1 = arith.constant 0 : i32
    return %c0_i32, %c0_i32_0 : i32, i32
  }
  func.func @transform_12(%arg0: i32) -> (i32, i32) {
    %c0_i32 = arith.constant 0 : i32
    %c0_i32_0 = arith.constant 0 : i32
    %c0_i32_1 = arith.constant 0 : i32
    return %c0_i32, %c0_i32_0 : i32, i32
  }
  func.func @transform_13(%arg0: i32) -> (i32, i32) {
    %c0_i32 = arith.constant 0 : i32
    %c0_i32_0 = arith.constant 0 : i32
    %c0_i32_1 = arith.constant 0 : i32
    return %c0_i32, %c0_i32_0 : i32, i32
  }
  func.func @transform_14(%arg0: i32) -> (i32, i32) {
    %c0_i32 = arith.constant 0 : i32
    %c0_i32_0 = arith.constant 0 : i32
    return %arg0, %c0_i32 : i32, i32
  }
}

</mosaic_0001>

<bundles_post_ra>
// kernel: source_separator_forward.2
= control target key start
LH: loop header
LB: loop body
LE: loop exit
PB: predicated region body
PF: predicated region fallthrough
CT: control target
= control target key end

     0   :  { %13 = vsyncpa [#allocation3], 0  ;;  %s2010_s0 = inlined_call_operand.vmem [shape: f32[17,66], index: 0, kind: input, shape index: {}]   ;;  %s2011_s1 = inlined_call_operand.vmem [shape: f32[17,66], index: 1, kind: input, shape index: {}]   ;;  %s2012_s2 = inlined_call_operand.vmem [shape: f32[2,16], index: 2, kind: input, shape index: {}]   ;;  %s2013_s3 = inlined_call_operand.vmem [shape: f32[1,16], index: 3, kind: input, shape index: {}]   ;;  %s2014_s4 = inlined_call_operand.vmem [shape: f32[16,2], index: 4, kind: input, shape index: {}]   ;;  %s2015_s5 = inlined_call_operand.vmem [shape: f32[1,2], index: 5, kind: input, shape index: {}]   ;;  %s2016_s6 = inlined_call_operand.vmem [shape: bf16[66,128], index: 6, kind: input, shape index: {}]   ;;  %s2017_s7 = inlined_call_operand.vmem [shape: bf16[66,128], index: 7, kind: input, shape index: {}]   ;;  %s2018_s8 = inlined_call_operand.vmem [shape: f32[17,128], index: 8, kind: output, shape index: {}]  }
   0x1   :  { %14 = vsyncpa [#allocation5], 0  ;;  %s36_s29 = sshll.u32 %s2013_s3, 4  ;;  %s37_s29 = int_to_ptr.vmem [resolvable:$true] %s36_s29 }
   0x2   :  { %15 = vsyncpa [#allocation8], 0  ;;  %s26_s10 = sshll.u32 %s2012_s2, 4  ;;  %s1061_s11 = scalar_lea.vmem %s37_s29, 16  ;;  %s27_s10 = int_to_ptr.vmem [resolvable:$true] %s26_s10 }
   0x3   :  { %p1062_p0 = scmp.ne.s32.totalorder %s37_s29, %s1061_s11  ;;  %p1066_p1 = scmp.lt.s32.totalorder %s37_s29, %s37_s29 }
   0x4   :  { %p1067_p2 = scmp.lt.s32.totalorder %s1061_s11, %s1061_s11 }
   0x6   :  { %p1068_p3 = por %p1067_p2, %p1066_p1 }
   0x8   :  { %p1069_p4 = pnand %p1068_p3, %p1062_p0 }
   0xa   :  { %1072 = shalt.err (!%p1069_p4)
}
   0xb   :  { %s1115_s12 = smov [#allocation4]   ;;  %s1073_s13 = scalar_lea.vmem %s27_s10, 32 }
   0xc   :  { %39 = dma.vmem_to_smem %s37_s29, 16, %s1115_s12, [#allocation5]  }
   0xd   :  { %p1074_p5 = scmp.ne.s32.totalorder %s27_s10, %s1073_s13  ;;  %p1078_p6 = scmp.lt.s32.totalorder %s27_s10, %s27_s10 }
   0xe   :  { %p1079_p7 = scmp.lt.s32.totalorder %s1073_s13, %s1073_s13 }
  0x10   :  { %p1080_p8 = por %p1079_p7, %p1078_p6 }
  0x12   :  { %p1081_p9 = pnand %p1080_p8, %p1074_p5 }
  0x14   :  { %1084 = shalt.err (!%p1081_p9)
}
  0x15   :  { %s1116_s3 = smov [#allocation2]   ;;  %s45_s15 = sshll.u32 %s2014_s4, 4  ;;  %s46_s15 = int_to_ptr.vmem [resolvable:$true] %s45_s15 }
  0x16   :  { %29 = dma.vmem_to_smem %s27_s10, 32, %s1116_s3, [#allocation3]  }
  0x17   :  { %s58_s18 = sshll.u32 %s2015_s5, 4  ;;  %s1085_s19 = scalar_lea.vmem %s46_s15, 256  ;;  %s59_s18 = int_to_ptr.vmem [resolvable:$true] %s58_s18 }
  0x18   :  { %p1086_p10 = scmp.ne.s32.totalorder %s46_s15, %s1085_s19  ;;  %p1090_p11 = scmp.lt.s32.totalorder %s46_s15, %s46_s15 }
  0x19   :  { %p1091_p12 = scmp.lt.s32.totalorder %s1085_s19, %s1085_s19 }
  0x1b   :  { %p1092_p13 = por %p1091_p12, %p1090_p11 }
  0x1d   :  { %p1093_p0 = pnand %p1092_p13, %p1086_p10 }
  0x1f   :  { %1096 = shalt.err (!%p1093_p0)
}
  0x20   :  { %s1117_s20 = smov [#allocation6]   ;;  %s1118_s21 = smov 128  }
  0x21   :  { %s1119_s22 = smov 8   ;;  %s1097_s23 = scalar_lea.vmem %s59_s18, 16 }
  0x22   :  { %51 = dma.vmem_to_smem %s46_s15, 256, %s1117_s20, [#allocation5], %s1118_s21, %s1118_s21, %s1119_s22  }
  0x23   :  { %p1098_p1 = scmp.ne.s32.totalorder %s59_s18, %s1097_s23  ;;  %p1102_p2 = scmp.lt.s32.totalorder %s59_s18, %s59_s18 }
  0x24   :  { %p1103_p3 = scmp.lt.s32.totalorder %s1097_s23, %s1097_s23 }
  0x26   :  { %p1104_p4 = por %p1103_p3, %p1102_p2 }
  0x28   :  { %p1105_p5 = pnand %p1104_p4, %p1098_p1 }
  0x2a   :  { %1108 = shalt.err (!%p1105_p5)
}
  0x2b   :  { %s1120_s4 = smov [#allocation7]  }
  0x2c   :  { %61 = dma.vmem_to_smem %s59_s18, 16, %s1120_s4, [#allocation8]  }
  0x2d   :  { %1109 = dma.done.wait [#allocation3], 32  }
  0x2e   :  { %1110 = vsyncadd [#allocation3], 4294967264 }
  0x2f   :  { %1111 = dma.done.wait [#allocation5], 272  }
  0x30   :  { %1112 = vsyncadd [#allocation5], 4294967024 }
  0x31   :  { %1113 = dma.done.wait [#allocation8], 16  }
  0x32   :  { %1114 = vsyncadd [#allocation8], 4294967280 }
  0x33   :  { %78 = sfence }
  0x34   :  { %v1049_v0 = vld [vmem:[%s2017_s7] sm:$0xff]   ;;  %v1051_v2 = vld [vmem:[%s2017_s7 + $0x8] sm:$0xff]   ;;  %v1053_v4 = vld [vmem:[%s2017_s7 + $0x10] sm:$0xff]   ;;  %s86_s17 = sld [smem:[#allocation7]]  ;;  %s904_s20 = sld [smem:[#allocation7 + $0x1]]  ;;  %vm758_vm0 = vcmask 1040384  }
  0x35   :  { %v1050_v1 = vld [vmem:[%s2016_s6] sm:$0xff]   ;;  %1010 = vmatprep.subr.bf16.mxu1 %v1049_v0  ;;  %v1052_v3 = vld [vmem:[%s2016_s6 + $0x8] sm:$0xff]   ;;  %v1054_v5 = vld [vmem:[%s2016_s6 + $0x10] sm:$0xff]   ;;  %s92_s21 = sld [smem:[#allocation2]]  ;;  %s1210_s5 = sld [smem:[#allocation6 + $0x1]]  ;;  %vm751_vm1 = vcmask 539648  }
  0x36   :  { %1024 = vmatprep.subr.bf16.mxu0 %v1050_v1  ;;  %1011 = vmatpush3.bf16.msra.mxu1 %v1049_v0  ;;  %v1055_v6 = vld [vmem:[%s2017_s7 + $0x18] sm:$0xff]   ;;  %v1057_v8 = vld [vmem:[%s2017_s7 + $0x20] ss:$0 sps:$4 sm:$0x11]   ;;  %s905_s22 = sld [smem:[#allocation2 + $0x80]]  ;;  %v1220_v11 = vld [vmem:[%s2010_s0 + $0x8] sm:$0xff] }
  0x37   :  { %1025 = vmatpush3.bf16.msra.mxu0 %v1050_v1  ;;  %1012 = vmatprep.subr.bf16.mxu1 %v1051_v2  ;;  %v1056_v7 = vld [vmem:[%s2016_s6 + $0x18] sm:$0xff]   ;;  %v1058_v9 = vld [vmem:[%s2016_s6 + $0x20] ss:$0 sps:$4 sm:$0x11]   ;;  %s105_s23 = sld [smem:[#allocation4]]  ;;  %s1222_s6 = sld [smem:[#allocation2 + $0x1]] }
  0x38   :  { %1026 = vmatprep.subr.bf16.mxu0 %v1052_v3  ;;  %s1208_s4 = sld [smem:[#allocation6]]  ;;  %v1215_v10 = vld [vmem:[%s2010_s0] sm:$0xff]  ;;  %s1224_s27 = sld [smem:[#allocation2 + $0x81]]  ;;  %v760_v12 = vsel %vm758_vm0, %v1057_v8, 0  ;;  %v1240_v14 = vld [vmem:[%s2011_s1 + $0x8] sm:$0xff]  ;;  %v1249_v15 = vld [vmem:[%s2010_s0 + $0x10] sm:$0xff] }
  0x39   :  { %v1230_v13 = vld [vmem:[%s2011_s1] sm:$0xff]  ;;  %s1232_s30 = sld [smem:[#allocation4 + $0x1]]  ;;  %s1234_s9 = sld [smem:[#allocation6 + $0x80]]  ;;  %v844_v16 = vsel %vm758_vm0, %v1058_v9, 0  ;;  %v1264_v20 = vld [vmem:[%s2011_s1 + $0x10] sm:$0xff] }
  0x3a   :  { %1013 = vmatpush3.bf16.msra.mxu1 %v1051_v2  ;;  %s1242_s12 = sld [smem:[#allocation6 + $0x81]]  ;;  %s1244_s13 = sld [smem:[#allocation2 + $0x2]]  ;;  %v1253_v17 = vstv %s86_s17  ;;  %v1255_v18 = vstv %s904_s20 }
  0x3b   :  { %1027 = vmatpush3.bf16.msra.mxu0 %v1052_v3  ;;  %1014 = vmatprep.subr.bf16.mxu1 %v1053_v4  ;;  %v93_v19 = vstv %s92_s21  ;;  %s1257_s14 = sld [smem:[#allocation2 + $0x82]]  ;;  %v1276_v28 = vstv %s1210_s5  ;;  %s1312_s17 = sld [smem:[#allocation6 + $0x100]] }
  0x3c   :  { %1028 = vmatprep.subr.bf16.mxu0 %v1054_v5  ;;  %s1259_s15 = sld [smem:[#allocation4 + $0x2]]  ;;  %v94_v21 = vmul.f32 %v93_v19, %v1215_v10  ;;  %v95_v22 = vmul.f32 %v93_v19, %v1220_v11  ;;  %v98_v23 = vstv %s905_s22  ;;  %v1285_v31 = vmul.f32 %v93_v19, %v1249_v15  ;;  %s1314_s19 = sld [smem:[#allocation6 + $0x101]] }
  0x3d   :  { %v1268_v24 = vstv %s105_s23  ;;  %v99_v25 = vmul.f32 %v98_v23, %v1230_v13  ;;  %v100_v26 = vmul.f32 %v98_v23, %v1240_v14  ;;  %v1279_v29 = vstv %s1222_s6  ;;  %s1326_s20 = sld [smem:[#allocation2 + $0x3]]  ;;  %s1342_s23 = sld [smem:[#allocation6 + $0x180]] }
  0x3e   :  { %1015 = vmatpush3.bf16.msra.mxu1 %v1053_v4  ;;  %v1273_v27 = vstv %s1208_s4  ;;  %v1282_v30 = vstv %s1224_s27  ;;  %v1288_v32 = vmul.f32 %v98_v23, %v1264_v20  ;;  %v131_v35 = vmul.f32 %v1279_v29, %v1215_v10  ;;  %s1328_s21 = sld [smem:[#allocation2 + $0x83]]  ;;  %s1352_s4 = sld [smem:[#allocation6 + $0x181]] }
  0x3f   :  { %1029 = vmatpush3.bf16.msra.mxu0 %v1054_v5  ;;  %1016 = vmatprep.subr.bf16.mxu1 %v1055_v6  ;;  %v102_v33 = vadd.f32 %v99_v25, %v94_v21  ;;  %v103_v34 = vadd.f32 %v100_v26, %v95_v22  ;;  %v132_v36 = vmul.f32 %v1279_v29, %v1220_v11  ;;  %v1299_v39 = vstv %s1232_s30  ;;  %s1340_s22 = sld [smem:[#allocation4 + $0x3]]  ;;  %s1354_s5 = sld [smem:[#allocation2 + $0x4]] }
  0x40   :  { %1030 = vmatprep.subr.bf16.mxu0 %v1056_v7  ;;  %v136_v37 = vmul.f32 %v1282_v30, %v1230_v13  ;;  %v137_v38 = vmul.f32 %v1282_v30, %v1240_v14  ;;  %v1302_v40 = vstv %s1234_s9  ;;  %v1307_v43 = vstv %s1242_s12  ;;  %s1364_s24 = sld [smem:[#allocation2 + $0x84]]  ;;  %s1368_s25 = sld [smem:[#allocation6 + $0x200]] }
  0x41   :  { %v107_v41 = vadd.f32 %v1268_v24, %v102_v33  ;;  %v108_v42 = vadd.f32 %v1268_v24, %v103_v34  ;;  %v1310_v44 = vstv %s1244_s13  ;;  %v1321_v51 = vstv %s1257_s14  ;;  %s1366_s7 = sld [smem:[#allocation4 + $0x4]]  ;;  %s1370_s26 = sld [smem:[#allocation6 + $0x201]] }
  0x42   :  { %1017 = vmatpush3.bf16.msra.mxu1 %v1055_v6  ;;  %v139_v45 = vadd.f32 %v136_v37, %v131_v35  ;;  %v140_v46 = vadd.f32 %v137_v38, %v132_v36  ;;  %v168_v47 = vmul.f32 %v1310_v44, %v1215_v10  ;;  %v169_v48 = vmul.f32 %v1310_v44, %v1220_v11  ;;  %s1378_s6 = sld [smem:[#allocation2 + $0x5]]  ;;  %s1402_s29 = sld [smem:[#allocation6 + $0x280]] }
  0x43   :  { %1031 = vmatpush3.bf16.msra.mxu0 %v1056_v7  ;;  %1041 = vmatprep.subr.msk.bf16.mxu1 %vm758_vm0, %v1057_v8  ;;  %v110_v49 = vmax.f32 %v107_v41, 0.0  ;;  %v111_v50 = vmax.f32 %v108_v42, 0.0  ;;  %v1324_v52 = vstv %s1259_s15  ;;  %v173_v55 = vmul.f32 %v1321_v51, %v1230_v13  ;;  %s1380_s27 = sld [smem:[#allocation2 + $0x85]]  ;;  %s1412_s30 = sld [smem:[#allocation6 + $0x281]] }
  0x44   :  { %1042 = vmatprep.subr.msk.bf16.mxu0 %vm758_vm0, %v1058_v9  ;;  %v144_v53 = vadd.f32 %v1299_v39, %v139_v45  ;;  %v145_v54 = vadd.f32 %v1299_v39, %v140_v46  ;;  %v174_v56 = vmul.f32 %v1321_v51, %v1240_v14  ;;  %v1362_v19 = vstv %s1314_s19  ;;  %s1400_s28 = sld [smem:[#allocation4 + $0x5]]  ;;  %s1414_s9 = sld [smem:[#allocation2 + $0x6]] }
  0x45   :  { %v115_v57 = vmul.f32 %v1273_v27, %v110_v49  ;;  %v116_v58 = vmul.f32 %v1273_v27, %v111_v50  ;;  %v123_v59 = vmul.f32 %v1276_v28, %v110_v49  ;;  %v124_v60 = vmul.f32 %v1276_v28, %v111_v50  ;;  %s1430_s10 = sld [smem:[#allocation2 + $0x86]]  ;;  %s1454_s12 = sld [smem:[#allocation6 + $0x300]] }
  0x46   :  { %1019 = vmatpush3.bf16.msra.mxu1 %v760_v12  ;;  %v147_v61 = vmax.f32 %v144_v53, 0.0  ;;  %v148_v62 = vmax.f32 %v145_v54, 0.0  ;;  %v176_v63 = vadd.f32 %v173_v55, %v168_v47  ;;  %v177_v0 = vadd.f32 %v174_v56, %v169_v48  ;;  %s1432_s11 = sld [smem:[#allocation4 + $0x6]]  ;;  %s1456_s13 = sld [smem:[#allocation6 + $0x301]] }
  0x47   :  { %1033 = vmatpush3.bf16.msra.mxu0 %v844_v16  ;;  %v118_v1 = vadd.f32 %v115_v57, %v1253_v17  ;;  %v119_v2 = vadd.f32 %v116_v58, %v1253_v17  ;;  %v126_v3 = vadd.f32 %v123_v59, %v1255_v18  ;;  %v127_v4 = vadd.f32 %v124_v60, %v1255_v18  ;;  %s1464_s3 = sld [smem:[#allocation2 + $0x7]]  ;;  %s1496_s15 = sld [smem:[#allocation6 + $0x380]] }
  0x48   :  { %v152_v5 = vmul.f32 %v1302_v40, %v147_v61  ;;  %v153_v6 = vmul.f32 %v1302_v40, %v148_v62  ;;  %v160_v7 = vmul.f32 %v1307_v43, %v147_v61  ;;  %v161_v8 = vmul.f32 %v1307_v43, %v148_v62  ;;  %s1466_s2 = sld [smem:[#allocation2 + $0x87]]  ;;  %s1504_s16 = sld [smem:[#allocation6 + $0x381]] }
  0x49   :  { %v181_v9 = vadd.f32 %v1324_v52, %v176_v63  ;;  %v182_v12 = vadd.f32 %v1324_v52, %v177_v0  ;;  %v1359_v16 = vstv %s1312_s17  ;;  %v1373_v34 = vstv %s1326_s20  ;;  %s1494_s14 = sld [smem:[#allocation4 + $0x7]]  ;;  %s1506_s18 = sld [smem:[#allocation2 + $0x8]] }
  0x4a   :  { %v155_v21 = vadd.f32 %v152_v5, %v118_v1  ;;  %v156_v22 = vadd.f32 %v153_v6, %v119_v2  ;;  %v163_v23 = vadd.f32 %v160_v7, %v126_v3  ;;  %v164_v25 = vadd.f32 %v161_v8, %v127_v4  ;;  %s1524_s17 = sld [smem:[#allocation2 + $0x88]] }
  0x4b   :  { %v184_v26 = vmax.f32 %v181_v9, 0.0  ;;  %v185_v33 = vmax.f32 %v182_v12, 0.0  ;;  %v1376_v35 = vstv %s1328_s21  ;;  %v205_v36 = vmul.f32 %v1373_v34, %v1215_v10  ;;  %s1526_s19 = sld [smem:[#allocation4 + $0x8]]  ;;  %s1536_s21 = sld [smem:[#allocation6 + $0x401]] }
  0x4c   :  { %v206_v37 = vmul.f32 %v1373_v34, %v1220_v11  ;;  %v210_v38 = vmul.f32 %v1376_v35, %v1230_v13  ;;  %v211_v41 = vmul.f32 %v1376_v35, %v1240_v14  ;;  %v1395_v50 = vstv %s1340_s22  ;;  %s1534_s20 = sld [smem:[#allocation6 + $0x400]]  ;;  %s1538_s22 = sld [smem:[#allocation2 + $0x9]] }
  0x4d   :  { %v189_v42 = vmul.f32 %v1359_v16, %v184_v26  ;;  %v190_v45 = vmul.f32 %v1359_v16, %v185_v33  ;;  %v197_v46 = vmul.f32 %v1362_v19, %v184_v26  ;;  %v198_v47 = vmul.f32 %v1362_v19, %v185_v33 }
  0x4e   :  { %v213_v48 = vadd.f32 %v210_v38, %v205_v36  ;;  %v214_v49 = vadd.f32 %v211_v41, %v206_v37  ;;  %v1398_v53 = vstv %s1342_s23  ;;  %v1407_v60 = vstv %s1352_s4  ;;  %s1540_s23 = sld [smem:[#allocation2 + $0x89]] }
  0x4f   :  { %v192_v54 = vadd.f32 %v189_v42, %v155_v21  ;;  %v193_v55 = vadd.f32 %v190_v45, %v156_v22  ;;  %v200_v56 = vadd.f32 %v197_v46, %v163_v23  ;;  %v201_v57 = vadd.f32 %v198_v47, %v164_v25  ;;  %s1566_s4 = sld [smem:[#allocation4 + $0x9]] }
  0x50   :  { %v218_v58 = vadd.f32 %v1395_v50, %v213_v48  ;;  %v219_v59 = vadd.f32 %v1395_v50, %v214_v49  ;;  %v1410_v61 = vstv %s1354_s5  ;;  %v1421_v0 = vstv %s1364_s24  ;;  %s1568_s5 = sld [smem:[#allocation6 + $0x480]]  ;;  %s1578_s24 = sld [smem:[#allocation6 + $0x481]] }
  0x51   :  { %v242_v62 = vmul.f32 %v1410_v61, %v1215_v10  ;;  %v243_v63 = vmul.f32 %v1410_v61, %v1220_v11  ;;  %v1424_v1 = vstv %s1366_s7  ;;  %v247_v4 = vmul.f32 %v1421_v0, %v1230_v13  ;;  %s1580_s7 = sld [smem:[#allocation2 + $0xa]] }
  0x52   :  { %v221_v2 = vmax.f32 %v218_v58, 0.0  ;;  %v222_v3 = vmax.f32 %v219_v59, 0.0  ;;  %v248_v5 = vmul.f32 %v1421_v0, %v1240_v14  ;;  %v1435_v6 = vstv %s1368_s25  ;;  %s1606_s25 = sld [smem:[#allocation2 + $0x8a]] }
  0x53   :  { %2067 = vst [vmem:[#allocation12_spill] sm:$0xff] %v1435_v6  ;;  %v1438_v7 = vstv %s1370_s26  ;;  %v1441_v8 = vstv %s1378_s6  ;;  %v1444_v9 = vstv %s1380_s27  ;;  %v250_v25 = vadd.f32 %v247_v4, %v242_v62  ;;  %s1608_s26 = sld [smem:[#allocation4 + $0xa]]  ;;  %s1616_s6 = sld [smem:[#allocation6 + $0x500]] }
  0x54   :  { %2068 = vst [vmem:[#allocation13_spill] sm:$0xff] %v1438_v7  ;;  %v226_v12 = vmul.f32 %v1398_v53, %v221_v2  ;;  %v227_v21 = vmul.f32 %v1398_v53, %v222_v3  ;;  %v234_v22 = vmul.f32 %v1407_v60, %v221_v2  ;;  %v235_v23 = vmul.f32 %v1407_v60, %v222_v3  ;;  %s1618_s27 = sld [smem:[#allocation6 + $0x501]] }
  0x55   :  { %v251_v26 = vadd.f32 %v248_v5, %v243_v63  ;;  %v279_v33 = vmul.f32 %v1441_v8, %v1215_v10  ;;  %v280_v36 = vmul.f32 %v1441_v8, %v1220_v11  ;;  %v255_v45 = vadd.f32 %v1424_v1, %v250_v25 }
  0x56   :  { %v229_v37 = vadd.f32 %v226_v12, %v192_v54  ;;  %v230_v38 = vadd.f32 %v227_v21, %v193_v55  ;;  %v237_v41 = vadd.f32 %v234_v22, %v200_v56  ;;  %v238_v42 = vadd.f32 %v235_v23, %v201_v57 }
  0x57   :  { %v256_v46 = vadd.f32 %v1424_v1, %v251_v26  ;;  %v284_v47 = vmul.f32 %v1444_v9, %v1230_v13  ;;  %v285_v48 = vmul.f32 %v1444_v9, %v1240_v14  ;;  %v1469_v49 = vstv %s1400_s28  ;;  %s1620_s28 = sld [smem:[#allocation2 + $0xb]] }
  0x58   :  { %2069 = vst [vmem:[#allocation14_spill] sm:$0xff] %v1469_v49  ;;  %v1472_v54 = vstv %s1402_s29  ;;  %v1475_v55 = vstv %s1412_s30  ;;  %v1478_v56 = vstv %s1414_s9  ;;  %v258_v57 = vmax.f32 %v255_v45, 0.0  ;;  %s1622_s29 = sld [smem:[#allocation2 + $0x8b]]  ;;  %s1648_s9 = sld [smem:[#allocation6 + $0x580]] }
  0x59   :  { %2070 = vst [vmem:[#allocation15_spill] sm:$0xff] %v1472_v54  ;;  %2071 = vst [vmem:[#allocation16_spill] sm:$0xff] %v1475_v55  ;;  %v259_v58 = vmax.f32 %v256_v46, 0.0  ;;  %v287_v59 = vadd.f32 %v284_v47, %v279_v33  ;;  %v288_v62 = vadd.f32 %v285_v48, %v280_v36  ;;  %v316_v63 = vmul.f32 %v1478_v56, %v1215_v10  ;;  %s1646_s30 = sld [smem:[#allocation4 + $0xb]] }
  0x5a   :  { %2072 = vst [vmem:[#allocation17_spill] sm:$0xff] %v1478_v56  ;;  %v317_v2 = vmul.f32 %v1478_v56, %v1220_v11  ;;  %v1485_v3 = vstv %s1430_s10  ;;  %v1488_v4 = vstv %s1432_s11  ;;  %v263_v5 = vmul.f32 %v1435_v6, %v258_v57  ;;  %s1650_s10 = sld [smem:[#allocation6 + $0x581]]  ;;  %s1652_s11 = sld [smem:[#allocation2 + $0xc]] }
  0x5b   :  { %2073 = vst [vmem:[#allocation18_spill] sm:$0xff] %v1485_v3  ;;  %2074 = vst [vmem:[#allocation19_spill] sm:$0xff] %v1488_v4  ;;  %v264_v12 = vmul.f32 %v1435_v6, %v259_v58  ;;  %v271_v21 = vmul.f32 %v1438_v7, %v258_v57  ;;  %v272_v22 = vmul.f32 %v1438_v7, %v259_v58  ;;  %v1512_v7 = vstv %s1456_s13  ;;  %s1676_s13 = sld [smem:[#allocation4 + $0xc]] }
  0x5c   :  { %v292_v23 = vadd.f32 %v1469_v49, %v287_v59  ;;  %v293_v25 = vadd.f32 %v1469_v49, %v288_v62  ;;  %v321_v26 = vmul.f32 %v1485_v3, %v1230_v13  ;;  %v322_v33 = vmul.f32 %v1485_v3, %v1240_v14  ;;  %2076 = vst [vmem:[#allocation21_spill] sm:$0xff] %v1512_v7 }
  0x5d   :  { %v266_v36 = vadd.f32 %v263_v5, %v229_v37  ;;  %v267_v45 = vadd.f32 %v264_v12, %v230_v38  ;;  %v274_v46 = vadd.f32 %v271_v21, %v237_v41  ;;  %v275_v47 = vadd.f32 %v272_v22, %v238_v42 }
  0x5e   :  { %v295_v48 = vmax.f32 %v292_v23, 0.0  ;;  %v296_v57 = vmax.f32 %v293_v25, 0.0  ;;  %v324_v58 = vadd.f32 %v321_v26, %v316_v63  ;;  %v325_v59 = vadd.f32 %v322_v33, %v317_v2 }
  0x5f   :  { %v1509_v62 = vstv %s1454_s12  ;;  %v1515_v6 = vstv %s1464_s3  ;;  %v1518_v49 = vstv %s1466_s2  ;;  %s1674_s12 = sld [smem:[#allocation2 + $0x8c]]  ;;  %s1684_s3 = sld [smem:[#allocation6 + $0x600]] }
  0x60   :  { %2075 = vst [vmem:[#allocation20_spill] sm:$0xff] %v1509_v62  ;;  %2077 = vst [vmem:[#allocation22_spill] sm:$0xff] %v1518_v49  ;;  %v300_v3 = vmul.f32 %v1472_v54, %v295_v48  ;;  %v301_v56 = vmul.f32 %v1472_v54, %v296_v57  ;;  %v308_v37 = vmul.f32 %v1475_v55, %v295_v48  ;;  %v1547_v48 = vstv %s1494_s14  ;;  %s1686_s2 = sld [smem:[#allocation6 + $0x601]]  ;;  %s1694_s14 = sld [smem:[#allocation2 + $0xd]] }
  0x61   :  { %v309_v38 = vmul.f32 %v1475_v55, %v296_v57  ;;  %v329_v41 = vadd.f32 %v1488_v4, %v324_v58  ;;  %v330_v42 = vadd.f32 %v1488_v4, %v325_v59  ;;  %v353_v63 = vmul.f32 %v1515_v6, %v1215_v10  ;;  %2078 = vst [vmem:[#allocation23_spill] sm:$0xff] %v1547_v48 }
  0x62   :  { %v354_v2 = vmul.f32 %v1515_v6, %v1220_v11  ;;  %v303_v5 = vadd.f32 %v300_v3, %v266_v36  ;;  %v304_v12 = vadd.f32 %v301_v56, %v267_v45  ;;  %v311_v21 = vadd.f32 %v308_v37, %v274_v46 }
  0x63   :  { %v312_v22 = vadd.f32 %v309_v38, %v275_v47  ;;  %v332_v23 = vmax.f32 %v329_v41, 0.0  ;;  %v333_v25 = vmax.f32 %v330_v42, 0.0  ;;  %v358_v26 = vmul.f32 %v1518_v49, %v1230_v13 }
  0x64   :  { %v359_v33 = vmul.f32 %v1518_v49, %v1240_v14  ;;  %v1550_v57 = vstv %s1496_s15  ;;  %v1553_v3 = vstv %s1504_s16  ;;  %v1556_v56 = vstv %s1506_s18  ;;  %s1696_s15 = sld [smem:[#allocation2 + $0x8d]]  ;;  %s1724_s18 = sld [smem:[#allocation6 + $0x680]] }
  0x65   :  { %2079 = vst [vmem:[#allocation24_spill] sm:$0xff] %v1550_v57  ;;  %2080 = vst [vmem:[#allocation25_spill] sm:$0xff] %v1553_v3  ;;  %v337_v36 = vmul.f32 %v1509_v62, %v332_v23  ;;  %v338_v45 = vmul.f32 %v1509_v62, %v333_v25  ;;  %v345_v46 = vmul.f32 %v1512_v7, %v332_v23  ;;  %v1573_v23 = vstv %s1524_s17  ;;  %s1722_s16 = sld [smem:[#allocation4 + $0xd]]  ;;  %s1734_s17 = sld [smem:[#allocation6 + $0x681]] }
  0x66   :  { %2081 = vst [vmem:[#allocation26_spill] sm:$0xff] %v1556_v56  ;;  %v346_v47 = vmul.f32 %v1512_v7, %v333_v25  ;;  %v361_v58 = vadd.f32 %v358_v26, %v353_v63  ;;  %v362_v59 = vadd.f32 %v359_v33, %v354_v2  ;;  %v390_v37 = vmul.f32 %v1556_v56, %v1215_v10 }
  0x67   :  { %v391_v38 = vmul.f32 %v1556_v56, %v1220_v11  ;;  %v340_v41 = vadd.f32 %v337_v36, %v303_v5  ;;  %v341_v42 = vadd.f32 %v338_v45, %v304_v12  ;;  %v348_v55 = vadd.f32 %v345_v46, %v311_v21  ;;  %2082 = vst [vmem:[#allocation27_spill] sm:$0xff] %v1573_v23 }
  0x68   :  { %v349_v62 = vadd.f32 %v346_v47, %v312_v22  ;;  %v366_v63 = vadd.f32 %v1547_v48, %v361_v58  ;;  %v367_v2 = vadd.f32 %v1547_v48, %v362_v59  ;;  %v1576_v25 = vstv %s1526_s19  ;;  %s1736_s19 = sld [smem:[#allocation2 + $0xe]] }
  0x69   :  { %2083 = vst [vmem:[#allocation28_spill] sm:$0xff] %v1576_v25  ;;  %v395_v5 = vmul.f32 %v1573_v23, %v1230_v13  ;;  %v396_v12 = vmul.f32 %v1573_v23, %v1240_v14  ;;  %v1587_v21 = vstv %s1534_s20  ;;  %v1590_v22 = vstv %s1536_s21  ;;  %s1742_s20 = sld [smem:[#allocation2 + $0x8e]] }
  0x6a   :  { %2084 = vst [vmem:[#allocation29_spill] sm:$0xff] %v1587_v21  ;;  %2085 = vst [vmem:[#allocation30_spill] sm:$0xff] %v1590_v22  ;;  %v369_v26 = vmax.f32 %v366_v63, 0.0  ;;  %v370_v33 = vmax.f32 %v367_v2, 0.0  ;;  %v1593_v36 = vstv %s1538_s22  ;;  %v1596_v45 = vstv %s1540_s23  ;;  %s1744_s21 = sld [smem:[#allocation4 + $0xe]]  ;;  %s1766_s22 = sld [smem:[#allocation6 + $0x700]] }
  0x6b   :  { %2086 = vst [vmem:[#allocation31_spill] sm:$0xff] %v1593_v36  ;;  %2087 = vst [vmem:[#allocation32_spill] sm:$0xff] %v1596_v45  ;;  %v398_v46 = vadd.f32 %v395_v5, %v390_v37  ;;  %v399_v47 = vadd.f32 %v396_v12, %v391_v38  ;;  %v427_v58 = vmul.f32 %v1593_v36, %v1215_v10  ;;  %v1625_v4 = vstv %s1566_s4  ;;  %s1768_s23 = sld [smem:[#allocation6 + $0x701]]  ;;  %s1776_s4 = sld [smem:[#allocation2 + $0xf]] }
  0x6c   :  { %v428_v59 = vmul.f32 %v1593_v36, %v1220_v11  ;;  %v374_v7 = vmul.f32 %v1550_v57, %v369_v26  ;;  %v375_v54 = vmul.f32 %v1550_v57, %v370_v33  ;;  %v382_v48 = vmul.f32 %v1553_v3, %v369_v26  ;;  %2088 = vst [vmem:[#allocation33_spill] sm:$0xff] %v1625_v4 }
  0x6d   :  { %v383_v63 = vmul.f32 %v1553_v3, %v370_v33  ;;  %v403_v37 = vadd.f32 %v1576_v25, %v398_v46  ;;  %v404_v38 = vadd.f32 %v1576_v25, %v399_v47  ;;  %v432_v2 = vmul.f32 %v1596_v45, %v1230_v13 }
  0x6e   :  { %v433_v5 = vmul.f32 %v1596_v45, %v1240_v14  ;;  %v377_v12 = vadd.f32 %v374_v7, %v340_v41  ;;  %v378_v26 = vadd.f32 %v375_v54, %v341_v42  ;;  %v385_v33 = vadd.f32 %v382_v48, %v348_v55 }
  0x6f   :  { %v386_v46 = vadd.f32 %v383_v63, %v349_v62  ;;  %v406_v3 = vmax.f32 %v403_v37, 0.0  ;;  %v407_v57 = vmax.f32 %v404_v38, 0.0  ;;  %v435_v47 = vadd.f32 %v432_v2, %v427_v58 }
  0x70   :  { %v436_v25 = vadd.f32 %v433_v5, %v428_v59  ;;  %v1628_v45 = vstv %s1568_s5  ;;  %v1631_v36 = vstv %s1578_s24  ;;  %v1634_v23 = vstv %s1580_s7  ;;  %s1778_s5 = sld [smem:[#allocation2 + $0x8f]]  ;;  %s1814_s7 = sld [smem:[#allocation6 + $0x780]] }
  0x71   :  { %2089 = vst [vmem:[#allocation34_spill] sm:$0xff] %v1628_v45  ;;  %2090 = vst [vmem:[#allocation35_spill] sm:$0xff] %v1631_v36  ;;  %v411_v7 = vmul.f32 %v1587_v21, %v406_v3  ;;  %v412_v54 = vmul.f32 %v1587_v21, %v407_v57  ;;  %v419_v55 = vmul.f32 %v1590_v22, %v406_v3  ;;  %v1655_v38 = vstv %s1606_s25  ;;  %s1806_s24 = sld [smem:[#allocation4 + $0xf]]  ;;  %s1816_s25 = sld [smem:[#allocation6 + $0x781]] }
  0x72   :  { %2091 = vst [vmem:[#allocation36_spill] sm:$0xff] %v1634_v23  ;;  %v420_v62 = vmul.f32 %v1590_v22, %v407_v57  ;;  %v440_v48 = vadd.f32 %v1625_v4, %v435_v47  ;;  %v441_v41 = vadd.f32 %v1625_v4, %v436_v25  ;;  %v464_v42 = vmul.f32 %v1634_v23, %v1215_v10 }
  0x73   :  { %v465_v58 = vmul.f32 %v1634_v23, %v1220_v11  ;;  %v414_v3 = vadd.f32 %v411_v7, %v377_v12  ;;  %v415_v59 = vadd.f32 %v412_v54, %v378_v26  ;;  %v422_v57 = vadd.f32 %v419_v55, %v385_v33  ;;  %2092 = vst [vmem:[#allocation37_spill] sm:$0xff] %v1655_v38 }
  0x74   :  { %v423_v63 = vadd.f32 %v420_v62, %v386_v46  ;;  %v443_v25 = vmax.f32 %v440_v48, 0.0  ;;  %v444_v37 = vmax.f32 %v441_v41, 0.0  ;;  %v1658_v2 = vstv %s1608_s26 }
  0x75   :  { %2093 = vst [vmem:[#allocation38_spill] sm:$0xff] %v1658_v2  ;;  %v469_v5 = vmul.f32 %v1655_v38, %v1230_v13  ;;  %v470_v12 = vmul.f32 %v1655_v38, %v1240_v14  ;;  %v1665_v26 = vstv %s1616_s6  ;;  %v1668_v33 = vstv %s1618_s27 }
  0x76   :  { %2094 = vst [vmem:[#allocation39_spill] sm:$0xff] %v1665_v26  ;;  %2095 = vst [vmem:[#allocation40_spill] sm:$0xff] %v1668_v33  ;;  %v448_v46 = vmul.f32 %v1628_v45, %v443_v25  ;;  %v449_v47 = vmul.f32 %v1628_v45, %v444_v37  ;;  %v456_v7 = vmul.f32 %v1631_v36, %v443_v25  ;;  %v1679_v48 = vstv %s1620_s28 }
  0x77   :  { %v457_v54 = vmul.f32 %v1631_v36, %v444_v37  ;;  %v472_v55 = vadd.f32 %v469_v5, %v464_v42  ;;  %v473_v62 = vadd.f32 %v470_v12, %v465_v58  ;;  %2096 = vst [vmem:[#allocation41_spill] sm:$0xff] %v1679_v48  ;;  %v1682_v41 = vstv %s1622_s29 }
  0x78   :  { %2097 = vst [vmem:[#allocation42_spill] sm:$0xff] %v1682_v41  ;;  %v451_v22 = vadd.f32 %v448_v46, %v414_v3  ;;  %v452_v21 = vadd.f32 %v449_v47, %v415_v59  ;;  %v459_v38 = vadd.f32 %v456_v7, %v422_v57  ;;  %v501_v58 = vmul.f32 %v1679_v48, %v1215_v10 }
  0x79   :  { %v460_v45 = vadd.f32 %v457_v54, %v423_v63  ;;  %v477_v25 = vadd.f32 %v1658_v2, %v472_v55  ;;  %v478_v42 = vadd.f32 %v1658_v2, %v473_v62  ;;  %v502_v37 = vmul.f32 %v1679_v48, %v1220_v11 }
  0x7a   :  { %v506_v3 = vmul.f32 %v1682_v41, %v1230_v13  ;;  %v507_v59 = vmul.f32 %v1682_v41, %v1240_v14  ;;  %v1703_v57 = vstv %s1646_s30  ;;  %v1706_v63 = vstv %s1648_s9 }
  0x7b   :  { %2098 = vst [vmem:[#allocation43_spill] sm:$0xff] %v1703_v57  ;;  %2099 = vst [vmem:[#allocation44_spill] sm:$0xff] %v1706_v63  ;;  %v480_v5 = vmax.f32 %v477_v25, 0.0  ;;  %v481_v12 = vmax.f32 %v478_v42, 0.0  ;;  %v1709_v46 = vstv %s1650_s10  ;;  %v1712_v47 = vstv %s1652_s11 }
  0x7c   :  { %2100 = vst [vmem:[#allocation45_spill] sm:$0xff] %v1709_v46  ;;  %2101 = vst [vmem:[#allocation46_spill] sm:$0xff] %v1712_v47  ;;  %v509_v7 = vadd.f32 %v506_v3, %v501_v58  ;;  %v510_v54 = vadd.f32 %v507_v59, %v502_v37  ;;  %v538_v55 = vmul.f32 %v1712_v47, %v1215_v10  ;;  %v1729_v3 = vstv %s1674_s12 }
  0x7d   :  { %v539_v62 = vmul.f32 %v1712_v47, %v1220_v11  ;;  %v485_v2 = vmul.f32 %v1665_v26, %v480_v5  ;;  %v486_v36 = vmul.f32 %v1665_v26, %v481_v12  ;;  %v493_v25 = vmul.f32 %v1668_v33, %v480_v5  ;;  %2102 = vst [vmem:[#allocation47_spill] sm:$0xff] %v1729_v3 }
  0x7e   :  { %v494_v42 = vmul.f32 %v1668_v33, %v481_v12  ;;  %v514_v58 = vadd.f32 %v1703_v57, %v509_v7  ;;  %v515_v37 = vadd.f32 %v1703_v57, %v510_v54  ;;  %v1732_v59 = vstv %s1676_s13 }
  0x7f   :  { %2103 = vst [vmem:[#allocation48_spill] sm:$0xff] %v1732_v59  ;;  %v488_v5 = vadd.f32 %v485_v2, %v451_v22  ;;  %v489_v12 = vadd.f32 %v486_v36, %v452_v21  ;;  %v496_v33 = vadd.f32 %v493_v25, %v459_v38  ;;  %v543_v54 = vmul.f32 %v1729_v3, %v1230_v13 }
  0x80   :  { %v497_v26 = vadd.f32 %v494_v42, %v460_v45  ;;  %v517_v47 = vmax.f32 %v514_v58, 0.0  ;;  %v518_v7 = vmax.f32 %v515_v37, 0.0  ;;  %v544_v57 = vmul.f32 %v1729_v3, %v1240_v14 }
  0x81   :  { %v1747_v41 = vstv %s1684_s3  ;;  %v1750_v48 = vstv %s1686_s2  ;;  %v1753_v22 = vstv %s1694_s14  ;;  %v1756_v21 = vstv %s1696_s15 }
  0x82   :  { %2104 = vst [vmem:[#allocation49_spill] sm:$0xff] %v1747_v41  ;;  %2105 = vst [vmem:[#allocation50_spill] sm:$0xff] %v1750_v48  ;;  %v522_v36 = vmul.f32 %v1706_v63, %v517_v47  ;;  %v523_v45 = vmul.f32 %v1706_v63, %v518_v7  ;;  %v530_v38 = vmul.f32 %v1709_v46, %v517_v47  ;;  %v1825_v56 = vstv %s1776_s4 }
  0x83   :  { %2106 = vst [vmem:[#allocation51_spill] sm:$0xff] %v1753_v22  ;;  %2107 = vst [vmem:[#allocation52_spill] sm:$0xff] %v1756_v21  ;;  %v531_v2 = vmul.f32 %v1709_v46, %v518_v7  ;;  %v546_v25 = vadd.f32 %v543_v54, %v538_v55  ;;  %v547_v42 = vadd.f32 %v544_v57, %v539_v62  ;;  %v1828_v49 = vstv %s1778_s5 }
  0x84   :  { %v575_v58 = vmul.f32 %v1753_v22, %v1215_v10  ;;  %v576_v37 = vmul.f32 %v1753_v22, %v1220_v11  ;;  %v525_v3 = vadd.f32 %v522_v36, %v488_v5  ;;  %v526_v4 = vadd.f32 %v523_v45, %v489_v12 }
  0x85   :  { %v533_v23 = vadd.f32 %v530_v38, %v496_v33  ;;  %v534_v63 = vadd.f32 %v531_v2, %v497_v26  ;;  %v551_v47 = vadd.f32 %v1732_v59, %v546_v25  ;;  %v552_v57 = vadd.f32 %v1732_v59, %v547_v42 }
  0x86   :  { %v580_v55 = vmul.f32 %v1756_v21, %v1230_v13  ;;  %v581_v62 = vmul.f32 %v1756_v21, %v1240_v14  ;;  %v1781_v26 = vstv %s1722_s16  ;;  %v1784_v33 = vstv %s1724_s18 }
  0x87   :  { %2108 = vst [vmem:[#allocation53_spill] sm:$0xff] %v1781_v26  ;;  %2109 = vst [vmem:[#allocation54_spill] sm:$0xff] %v1784_v33  ;;  %v1787_v5 = vstv %s1734_s17  ;;  %v1790_v12 = vstv %s1736_s19  ;;  %v554_v7 = vmax.f32 %v551_v47, 0.0  ;;  %v555_v54 = vmax.f32 %v552_v57, 0.0 }
  0x88   :  { %2110 = vst [vmem:[#allocation55_spill] sm:$0xff] %v1787_v5  ;;  %2111 = vst [vmem:[#allocation56_spill] sm:$0xff] %v1790_v12  ;;  %v583_v36 = vadd.f32 %v580_v55, %v575_v58  ;;  %v584_v45 = vadd.f32 %v581_v62, %v576_v37  ;;  %v612_v38 = vmul.f32 %v1790_v12, %v1215_v10  ;;  %v1797_v25 = vstv %s1742_s20 }
  0x89   :  { %v613_v2 = vmul.f32 %v1790_v12, %v1220_v11  ;;  %2112 = vst [vmem:[#allocation57_spill] sm:$0xff] %v1797_v25  ;;  %v1800_v42 = vstv %s1744_s21  ;;  %v559_v46 = vmul.f32 %v1747_v41, %v554_v7  ;;  %v560_v59 = vmul.f32 %v1747_v41, %v555_v54 }
  0x8a   :  { %2113 = vst [vmem:[#allocation58_spill] sm:$0xff] %v1800_v42  ;;  %v567_v21 = vmul.f32 %v1750_v48, %v554_v7  ;;  %v568_v47 = vmul.f32 %v1750_v48, %v555_v54  ;;  %v588_v58 = vadd.f32 %v1781_v26, %v583_v36  ;;  %v589_v37 = vadd.f32 %v1781_v26, %v584_v45 }
  0x8b   :  { %v617_v57 = vmul.f32 %v1797_v25, %v1230_v13  ;;  %v618_v55 = vmul.f32 %v1797_v25, %v1240_v14  ;;  %v562_v62 = vadd.f32 %v559_v46, %v525_v3  ;;  %v563_v7 = vadd.f32 %v560_v59, %v526_v4 }
  0x8c   :  { %v570_v54 = vadd.f32 %v567_v21, %v533_v23  ;;  %v571_v48 = vadd.f32 %v568_v47, %v534_v63  ;;  %v591_v41 = vmax.f32 %v588_v58, 0.0  ;;  %v592_v36 = vmax.f32 %v589_v37, 0.0 }
  0x8d   :  { %v620_v12 = vadd.f32 %v617_v57, %v612_v38  ;;  %v621_v22 = vadd.f32 %v618_v55, %v613_v2  ;;  %v1819_v45 = vstv %s1766_s22  ;;  %v1822_v26 = vstv %s1768_s23 }
  0x8e   :  { %2114 = vst [vmem:[#allocation59_spill] sm:$0xff] %v1819_v45  ;;  %v596_v25 = vmul.f32 %v1784_v33, %v591_v41  ;;  %v597_v46 = vmul.f32 %v1784_v33, %v592_v36  ;;  %v604_v4 = vmul.f32 %v1787_v5, %v591_v41  ;;  %v605_v23 = vmul.f32 %v1787_v5, %v592_v36 }
  0x8f   :  { %v625_v63 = vadd.f32 %v1800_v42, %v620_v12  ;;  %v626_v3 = vadd.f32 %v1800_v42, %v621_v22  ;;  %v649_v59 = vmul.f32 %v1825_v56, %v1215_v10  ;;  %v650_v21 = vmul.f32 %v1825_v56, %v1220_v11 }
  0x90   :  { %v599_v38 = vadd.f32 %v596_v25, %v562_v62  ;;  %v600_v2 = vadd.f32 %v597_v46, %v563_v7  ;;  %v607_v47 = vadd.f32 %v604_v4, %v570_v54  ;;  %v608_v58 = vadd.f32 %v605_v23, %v571_v48 }
  0x91   :  { %v628_v37 = vmax.f32 %v625_v63, 0.0  ;;  %v629_v57 = vmax.f32 %v626_v3, 0.0  ;;  %v654_v41 = vmul.f32 %v1828_v49, %v1230_v13  ;;  %v655_v12 = vmul.f32 %v1828_v49, %v1240_v14 }
  0x92   :  { %v1845_v55 = vstv %s1806_s24  ;;  %v1848_v22 = vstv %s1814_s7  ;;  %v1851_v36 = vstv %s1816_s25  ;;  %v104_v25 = vadd.f32 %v1288_v32, %v1285_v31 }
  0x93   :  { %v633_v62 = vmul.f32 %v1819_v45, %v628_v37  ;;  %v634_v48 = vmul.f32 %v1819_v45, %v629_v57  ;;  %v641_v7 = vmul.f32 %v1822_v26, %v628_v37  ;;  %v642_v54 = vmul.f32 %v1822_v26, %v629_v57 }
  0x94   :  { %v657_v46 = vadd.f32 %v654_v41, %v649_v59  ;;  %v658_v4 = vadd.f32 %v655_v12, %v650_v21  ;;  %v109_v23 = vadd.f32 %v1268_v24, %v104_v25  ;;  %v133_v63 = vmul.f32 %v1279_v29, %v1249_v15 }
  0x95   :  { %v636_v3 = vadd.f32 %v633_v62, %v599_v38  ;;  %v637_v5 = vadd.f32 %v634_v48, %v600_v2  ;;  %v644_v33 = vadd.f32 %v641_v7, %v607_v47  ;;  %v645_v42 = vadd.f32 %v642_v54, %v608_v58 }
  0x96   :  { %v662_v31 = vadd.f32 %v1845_v55, %v657_v46  ;;  %v663_v32 = vadd.f32 %v1845_v55, %v658_v4  ;;  %v112_v45 = vmax.f32 %v109_v23, 0.0  ;;  %v138_v37 = vmul.f32 %v1282_v30, %v1264_v20 }
  0x97   :  { %v170_v59 = vmul.f32 %v1310_v44, %v1249_v15  ;;  %v175_v24 = vmul.f32 %v1321_v51, %v1264_v20  ;;  %v207_v29 = vmul.f32 %v1373_v34, %v1249_v15  ;;  %v212_v21 = vmul.f32 %v1376_v35, %v1264_v20 }
  0x98   :  { %v665_v38 = vmax.f32 %v662_v31, 0.0  ;;  %v666_v2 = vmax.f32 %v663_v32, 0.0  ;;  %v117_v47 = vmul.f32 %v1273_v27, %v112_v45  ;;  %v125_v58 = vmul.f32 %v1276_v28, %v112_v45 }
  0x99   :  { %v141_v30 = vadd.f32 %v138_v37, %v133_v63  ;;  %v178_v57 = vadd.f32 %v175_v24, %v170_v59  ;;  %v215_v41 = vadd.f32 %v212_v21, %v207_v29  ;;  %v244_v44 = vmul.f32 %v1410_v61, %v1249_v15 }
  0x9a   :  { %v670_v51 = vmul.f32 %v1848_v22, %v665_v38  ;;  %v671_v34 = vmul.f32 %v1848_v22, %v666_v2  ;;  %v678_v12 = vmul.f32 %v1851_v36, %v665_v38  ;;  %v679_v35 = vmul.f32 %v1851_v36, %v666_v2 }
  0x9b   :  { %v120_v25 = vadd.f32 %v117_v47, %v1253_v17  ;;  %v128_v27 = vadd.f32 %v125_v58, %v1255_v18  ;;  %v146_v28 = vadd.f32 %v1299_v39, %v141_v30  ;;  %v183_v45 = vadd.f32 %v1324_v52, %v178_v57  ;;  %v2115_v30 = vld [vmem:[#allocation17_spill] sm:$0xff] }
  0x9c   :  { %v673_v62 = vadd.f32 %v670_v51, %v636_v3  ;;  %v674_v48 = vadd.f32 %v671_v34, %v637_v5  ;;  %v681_v7 = vadd.f32 %v678_v12, %v644_v33  ;;  %v682_v61 = vadd.f32 %v679_v35, %v645_v42  ;;  %v2118_v12 = vld [vmem:[#allocation14_spill] sm:$0xff] }
  0x9d   :  { %v149_v54 = vmax.f32 %v146_v28, 0.0  ;;  %v186_v46 = vmax.f32 %v183_v45, 0.0  ;;  %v220_v4 = vadd.f32 %v1395_v50, %v215_v41  ;;  %v249_v23 = vmul.f32 %v1421_v0, %v1264_v20 }
  0x9e   :  { %v695_v63 = vmul.f32 %v681_v7, %v1215_v10  ;;  %v696_v17 = vmul.f32 %v682_v61, %v1220_v11  ;;  %v698_v18 = vmul.f32 %v673_v62, %v1230_v13  ;;  %v699_v39 = vmul.f32 %v674_v48, %v1240_v14 }
  0x9f   :  { %v684_v52 = vmul.f32 %v673_v62, %v1215_v10  ;;  %v685_v33 = vmul.f32 %v674_v48, %v1220_v11  ;;  %v687_v5 = vmul.f32 %v681_v7, %v1230_v13  ;;  %v688_v42 = vmul.f32 %v682_v61, %v1240_v14  ;;  %v2120_v62 = vld [vmem:[#allocation27_spill] sm:$0xff]  ;;  %v2122_v7 = vld [vmem:[#allocation32_spill] sm:$0xff] }
  0xa0   :  { %v701_v50 = vadd.f32 %v698_v18, %v695_v63  ;;  %v702_v3 = vadd.f32 %v699_v39, %v696_v17  ;;  %v154_v0 = vmul.f32 %v1302_v40, %v149_v54  ;;  %v162_v31 = vmul.f32 %v1307_v43, %v149_v54  ;;  %v2123_v54 = vld [vmem:[#allocation12_spill] sm:$0xff]  ;;  %v2125_v17 = vld [vmem:[#allocation19_spill] sm:$0xff] }
  0xa1   :  { %v690_v32 = vsub.f32 %v684_v52, %v687_v5  ;;  %v691_v37 = vsub.f32 %v685_v33, %v688_v42  ;;  %v191_v59 = vmul.f32 %v1359_v16, %v186_v46  ;;  %v199_v24 = vmul.f32 %v1362_v19, %v186_v46  ;;  %v2126_v39 = vld [vmem:[#allocation23_spill] sm:$0xff]  ;;  %v2127_v42 = vld [vmem:[#allocation36_spill] sm:$0xff] }
  0xa2   :  { %v704_v29 = vpack.c.bf16 %v702_v3, %v701_v50  ;;  %v157_v10 = vadd.f32 %v154_v0, %v120_v25  ;;  %v165_v21 = vadd.f32 %v162_v31, %v128_v27  ;;  %v223_v11 = vmax.f32 %v220_v4, 0.0  ;;  %v2119_v27 = vld [vmem:[#allocation26_spill] sm:$0xff]  ;;  %v2124_v4 = vld [vmem:[#allocation13_spill] sm:$0xff]  ;;  %v2128_v31 = vld [vmem:[#allocation15_spill] sm:$0xff] }
  0xa3   :  { %v693_v38 = vpack.c.bf16 %v691_v37, %v690_v32  ;;  %v252_v13 = vadd.f32 %v249_v23, %v244_v44  ;;  %v281_v14 = vmul.f32 %v1441_v8, %v1249_v15  ;;  %v286_v40 = vmul.f32 %v1444_v9, %v1264_v20  ;;  %v2116_v8 = vld [vmem:[#allocation18_spill] sm:$0xff]  ;;  %v2129_v37 = vld [vmem:[#allocation16_spill] sm:$0xff] }
  0xa4   :  { %1020 = vmatprep.mubr.msk.bf16.mxu1 %vm751_vm1, %v704_v29  ;;  %v194_v43 = vadd.f32 %v191_v59, %v157_v10  ;;  %v202_v2 = vadd.f32 %v199_v24, %v165_v21  ;;  %v228_v16 = vmul.f32 %v1398_v53, %v223_v11  ;;  %v236_v19 = vmul.f32 %v1407_v60, %v223_v11  ;;  %v2117_v53 = vld [vmem:[#allocation22_spill] sm:$0xff]  ;;  %v2130_v29 = vld [vmem:[#allocation28_spill] sm:$0xff]  ;;  %v2131_v21 = vld [vmem:[#allocation33_spill] sm:$0xff] }
  0xa5   :  { %1034 = vmatprep.mubr.msk.bf16.mxu0 %vm751_vm1, %v693_v38  ;;  %v257_v47 = vadd.f32 %v1424_v1, %v252_v13  ;;  %v289_v58 = vadd.f32 %v286_v40, %v281_v14  ;;  %v318_v57 = vmul.f32 %v2115_v30, %v1249_v15  ;;  %v323_v41 = vmul.f32 %v2116_v8, %v1264_v20  ;;  %v1922_v1 = vld [vmem:[%s2010_s0 + $0x10] sm:$0xff]  ;;  %v2132_v40 = vld [vmem:[#allocation37_spill] sm:$0xff] }
  0xa6   :  { %v231_v9 = vadd.f32 %v228_v16, %v194_v43  ;;  %v239_v44 = vadd.f32 %v236_v19, %v202_v2  ;;  %v355_v51 = vmul.f32 %v1515_v6, %v1249_v15  ;;  %v360_v34 = vmul.f32 %v2117_v53, %v1264_v20  ;;  %v2121_v15 = vld [vmem:[#allocation31_spill] sm:$0xff]  ;;  %v1945_v14 = vld [vmem:[%s2011_s1 + $0x10] sm:$0xff]  ;;  %v2133_v2 = vld [vmem:[#allocation41_spill] sm:$0xff] }
  0xa7   :  { %v260_v60 = vmax.f32 %v257_v47, 0.0  ;;  %v294_v35 = vadd.f32 %v2118_v12, %v289_v58  ;;  %v326_v25 = vadd.f32 %v323_v41, %v318_v57  ;;  %v392_v28 = vmul.f32 %v1922_v1, %v2119_v27  ;;  %v2134_v19 = vld [vmem:[#allocation20_spill] sm:$0xff]  ;;  %v2135_v58 = vld [vmem:[#allocation21_spill] sm:$0xff] }
  0xa8   :  { %v363_v45 = vadd.f32 %v360_v34, %v355_v51  ;;  %v397_v48 = vmul.f32 %v2120_v62, %v1264_v20  ;;  %v429_v6 = vmul.f32 %v1922_v1, %v2121_v15  ;;  %v434_v61 = vmul.f32 %v2122_v7, %v1264_v20  ;;  %v2136_v57 = vld [vmem:[#allocation24_spill] sm:$0xff]  ;;  %v2137_v41 = vld [vmem:[#allocation25_spill] sm:$0xff]  ;;  %v2138_v34 = vld [vmem:[#allocation42_spill] sm:$0xff] }
  0xa9   :  { %v265_v46 = vmul.f32 %v2123_v54, %v260_v60  ;;  %v273_v23 = vmul.f32 %v2124_v4, %v260_v60  ;;  %v297_v63 = vmax.f32 %v294_v35, 0.0  ;;  %v331_v18 = vadd.f32 %v2125_v17, %v326_v25  ;;  %v2139_v25 = vld [vmem:[#allocation46_spill] sm:$0xff]  ;;  %v2141_v62 = vld [vmem:[#allocation29_spill] sm:$0xff]  ;;  %v2144_v54 = vld [vmem:[#allocation35_spill] sm:$0xff] }
  0xaa   :  { %v368_v52 = vadd.f32 %v2126_v39, %v363_v45  ;;  %v400_v33 = vadd.f32 %v397_v48, %v392_v28  ;;  %v437_v5 = vadd.f32 %v434_v61, %v429_v6  ;;  %v466_v50 = vmul.f32 %v1922_v1, %v2127_v42  ;;  %v2140_v28 = vld [vmem:[#allocation47_spill] sm:$0xff]  ;;  %v2142_v15 = vld [vmem:[#allocation30_spill] sm:$0xff] }
  0xab   :  { %v268_v3 = vadd.f32 %v265_v46, %v231_v9  ;;  %v276_v0 = vadd.f32 %v273_v23, %v239_v44  ;;  %v302_v32 = vmul.f32 %v2128_v31, %v297_v63  ;;  %v310_v20 = vmul.f32 %v2129_v37, %v297_v63  ;;  %v2143_v7 = vld [vmem:[#allocation34_spill] sm:$0xff]  ;;  %v2149_v37 = vld [vmem:[#allocation43_spill] sm:$0xff] }
  0xac   :  { %v334_v59 = vmax.f32 %v331_v18, 0.0  ;;  %v371_v24 = vmax.f32 %v368_v52, 0.0  ;;  %v405_v10 = vadd.f32 %v2130_v29, %v400_v33  ;;  %v442_v11 = vadd.f32 %v2131_v21, %v437_v5  ;;  %v2145_v63 = vld [vmem:[#allocation38_spill] sm:$0xff]  ;;  %v2146_v52 = vld [vmem:[#allocation51_spill] sm:$0xff]  ;;  %v2147_v5 = vld [vmem:[#allocation52_spill] sm:$0xff] }
  0xad   :  { %v305_v38 = vadd.f32 %v302_v32, %v268_v3  ;;  %v313_v13 = vadd.f32 %v310_v20, %v276_v0  ;;  %v471_v43 = vmul.f32 %v1945_v14, %v2132_v40  ;;  %v503_v16 = vmul.f32 %v1922_v1, %v2133_v2  ;;  %v2152_v40 = vld [vmem:[#allocation39_spill] sm:$0xff]  ;;  %v2153_v2 = vld [vmem:[#allocation40_spill] sm:$0xff] }
  0xae   :  { %v339_v47 = vmul.f32 %v2134_v19, %v334_v59  ;;  %v347_v30 = vmul.f32 %v2135_v58, %v334_v59  ;;  %v376_v8 = vmul.f32 %v2136_v57, %v371_v24  ;;  %v384_v9 = vmul.f32 %v2137_v41, %v371_v24  ;;  %v2150_v59 = vld [vmem:[#allocation48_spill] sm:$0xff]  ;;  %v2154_v58 = vld [vmem:[#allocation53_spill] sm:$0xff] }
  0xaf   :  { %v408_v44 = vmax.f32 %v405_v10, 0.0  ;;  %v445_v51 = vmax.f32 %v442_v11, 0.0  ;;  %v474_v53 = vadd.f32 %v471_v43, %v466_v50  ;;  %v508_v60 = vmul.f32 %v1945_v14, %v2138_v34  ;;  %v2148_v50 = vld [vmem:[#allocation56_spill] sm:$0xff]  ;;  %v2151_v10 = vld [vmem:[#allocation57_spill] sm:$0xff] }
  0xb0   :  { %v342_v12 = vadd.f32 %v339_v47, %v305_v38  ;;  %v350_v35 = vadd.f32 %v347_v30, %v313_v13  ;;  %v540_v27 = vmul.f32 %v1922_v1, %v2139_v25  ;;  %v545_v45 = vmul.f32 %v1945_v14, %v2140_v28  ;;  %v2157_v34 = vld [vmem:[#allocation49_spill] sm:$0xff] }
  0xb1   :  { %v413_v48 = vmul.f32 %v2141_v62, %v408_v44  ;;  %v421_v6 = vmul.f32 %v2142_v15, %v408_v44  ;;  %v450_v61 = vmul.f32 %v2143_v7, %v445_v51  ;;  %v458_v46 = vmul.f32 %v2144_v54, %v445_v51  ;;  %v2155_v44 = vld [vmem:[#allocation44_spill] sm:$0xff]  ;;  %v2160_v15 = vld [vmem:[#allocation54_spill] sm:$0xff]  ;;  %v2161_v7 = vld [vmem:[#allocation55_spill] sm:$0xff] }
  0xb2   :  { %v379_v4 = vadd.f32 %v376_v8, %v342_v12  ;;  %v387_v23 = vadd.f32 %v384_v9, %v350_v35  ;;  %v479_v17 = vadd.f32 %v2145_v63, %v474_v53  ;;  %v511_v18 = vadd.f32 %v508_v60, %v503_v16  ;;  %v2156_v53 = vld [vmem:[#allocation45_spill] sm:$0xff]  ;;  %v2158_v12 = vld [vmem:[#allocation50_spill] sm:$0xff] }
  0xb3   :  { %v548_v39 = vadd.f32 %v545_v45, %v540_v27  ;;  %v577_v33 = vmul.f32 %v1922_v1, %v2146_v52  ;;  %v582_v42 = vmul.f32 %v1945_v14, %v2147_v5  ;;  %v614_v3 = vmul.f32 %v1922_v1, %v2148_v50  ;;  %v2159_v27 = vld [vmem:[#allocation58_spill] sm:$0xff] }
  0xb4   :  { %v416_v0 = vadd.f32 %v413_v48, %v379_v4  ;;  %v424_v31 = vadd.f32 %v421_v6, %v387_v23  ;;  %v482_v32 = vmax.f32 %v479_v17, 0.0  ;;  %v516_v20 = vadd.f32 %v2149_v37, %v511_v18  ;;  %v2162_v23 = vld [vmem:[#allocation59_spill] sm:$0xff] }
  0xb5   :  { %v553_v24 = vadd.f32 %v2150_v59, %v548_v39  ;;  %v585_v29 = vadd.f32 %v582_v42, %v577_v33  ;;  %v619_v21 = vmul.f32 %v1945_v14, %v2151_v10  ;;  %v651_v11 = vmul.f32 %v1922_v1, %v1825_v56 }
  0xb6   :  { %v453_v38 = vadd.f32 %v450_v61, %v416_v0  ;;  %v461_v13 = vadd.f32 %v458_v46, %v424_v31  ;;  %v487_v43 = vmul.f32 %v2152_v40, %v482_v32  ;;  %v495_v16 = vmul.f32 %v2153_v2, %v482_v32 }
  0xb7   :  { %v519_v19 = vmax.f32 %v516_v20, 0.0  ;;  %v556_v47 = vmax.f32 %v553_v24, 0.0  ;;  %v590_v30 = vadd.f32 %v2154_v58, %v585_v29  ;;  %v622_v57 = vadd.f32 %v619_v21, %v614_v3 }
  0xb8   :  { %v490_v8 = vadd.f32 %v487_v43, %v453_v38  ;;  %v498_v41 = vadd.f32 %v495_v16, %v461_v13  ;;  %v656_v9 = vmul.f32 %v1945_v14, %v1828_v49 }
  0xb9   :  { %v524_v51 = vmul.f32 %v2155_v44, %v519_v19  ;;  %v532_v56 = vmul.f32 %v2156_v53, %v519_v19  ;;  %v561_v60 = vmul.f32 %v2157_v34, %v556_v47  ;;  %v569_v35 = vmul.f32 %v2158_v12, %v556_v47 }
  0xba   :  { %v593_v25 = vmax.f32 %v590_v30, 0.0  ;;  %v627_v28 = vadd.f32 %v2159_v27, %v622_v57  ;;  %v659_v45 = vadd.f32 %v656_v9, %v651_v11 }
  0xbb   :  { %v527_v62 = vadd.f32 %v524_v51, %v490_v8  ;;  %v535_v48 = vadd.f32 %v532_v56, %v498_v41 }
  0xbc   :  { %v598_v6 = vmul.f32 %v2160_v15, %v593_v25  ;;  %v606_v61 = vmul.f32 %v2161_v7, %v593_v25  ;;  %v630_v54 = vmax.f32 %v627_v28, 0.0  ;;  %v664_v49 = vadd.f32 %v1845_v55, %v659_v45 }
  0xbd   :  { %v564_v46 = vadd.f32 %v561_v60, %v527_v62  ;;  %v572_v4 = vadd.f32 %v569_v35, %v535_v48 }
  0xbe   :  { %v635_v63 = vmul.f32 %v2162_v23, %v630_v54  ;;  %v643_v17 = vmul.f32 %v1822_v26, %v630_v54  ;;  %v667_v18 = vmax.f32 %v664_v49, 0.0 }
  0xbf   :  { %v601_v39 = vadd.f32 %v598_v6, %v564_v46  ;;  %v609_v52 = vadd.f32 %v606_v61, %v572_v4 }
  0xc0   :  { %v672_v33 = vmul.f32 %v1848_v22, %v667_v18  ;;  %v680_v5 = vmul.f32 %v1851_v36, %v667_v18 }
  0xc1   :  { %v638_v42 = vadd.f32 %v635_v63, %v601_v39  ;;  %v646_v50 = vadd.f32 %v643_v17, %v609_v52 }
  0xc3   :  { %v675_v3 = vadd.f32 %v672_v33, %v638_v42  ;;  %v683_v0 = vadd.f32 %v680_v5, %v646_v50 }
  0xc5   :  { %v697_v31 = vmul.f32 %v1922_v1, %v683_v0  ;;  %v700_v55 = vmul.f32 %v1945_v14, %v675_v3  ;;  %v686_v32 = vmul.f32 %v1922_v1, %v675_v3  ;;  %v689_v37 = vmul.f32 %v1945_v14, %v683_v0 }
  0xc7   :  { %v703_v26 = vadd.f32 %v700_v55, %v697_v31  ;;  %v692_v20 = vsub.f32 %v686_v32, %v689_v37 }
  0xc9   :  { %v705_v59 = vpack.c.bf16 %v703_v26, %v703_v26  ;;  %v694_v24 = vpack.c.bf16 %v692_v20, %v692_v20 }
  0xcb   :  { %1021 = vmatmul.mubr.msk.bf16.vlgmr.msra.gmra.mrb[0].mxu1 %vm751_vm1, %v705_v59  ;;  %1035 = vmatmul.mubr.msk.bf16.vlgmr.msra.gmra.mrb[0].mxu0 %vm751_vm1, %v694_v24 }
 0x19e   :  { %v1022_v22 = vpop.f32.mrb[0].mxu1  ;;  %v1036_v36 = vpop.f32.mrb[0].mxu0 }
 0x19f   :  { %v889_v29 = vadd.f32 %v1036_v36, %v1022_v22  ;;  %v796_v10 = vpop.f32.mrb[1].mxu1  ;;  %v880_v21 = vpop.f32.mrb[1].mxu0 }
 0x1a0   :  { %v881_v11 = vadd.f32 %v880_v21, %v796_v10  ;;  %v1023_v38 = vpop.f32.mrb[2].mxu1  ;;  %v1037_v13 = vpop.f32.mrb[2].mxu0 }
 0x1a1   :  { %896 = vst [vmem:[%s2018_s8 + $0x10] sm:$0xff] %v889_v29  ;;  %v799_v1 = vpop.f32.mrb[3].mxu1  ;;  %v883_v14 = vpop.f32.mrb[3].mxu0 }
 0x1a2   :  { %894 = vst [vmem:[%s2018_s8] sm:$0xff] %v881_v11  ;;  %v884_v40 = vadd.f32 %v883_v14, %v799_v1 }
 0x1a4   :  { %895 = vst [vmem:[%s2018_s8 + $0x8] sm:$0xff] %v884_v40 }
 0x1a5   :  { %901 = vsyncpa [#allocation3], 1 }
 0x1a6   :  { %902 = vsyncpa [#allocation5], 1 }
 0x1a7   :  { %903 = vsyncpa [#allocation8], 1 }

// kernel: source_separator_forward.3
= control target key start
LH: loop header
LB: loop body
LE: loop exit
PB: predicated region body
PF: predicated region fallthrough
CT: control target
= control target key end

     0   :  { %vm75_vm0 = vcmask 130048   ;;  %vm204_vm1 = vcmask 523264   ;;  %s1771_s1 = inlined_call_operand.vmem [shape: bf16[16,64], index: 1, kind: input, shape index: {}]   ;;  %s1772_s5 = inlined_call_operand.vmem [shape: bf16[4,32,64], index: 5, kind: input, shape index: {}]   ;;  %s1773_s6 = inlined_call_operand.vmem [shape: f32[4,1,64], index: 6, kind: input, shape index: {}]   ;;  %s1774_s7 = inlined_call_operand.vmem [shape: bf16[4,64,32], index: 7, kind: input, shape index: {}]   ;;  %s1775_s8 = inlined_call_operand.vmem [shape: f32[4,1,32], index: 8, kind: input, shape index: {}]   ;;  %s1776_s9 = inlined_call_operand.vmem [shape: bf16[32,128], index: 9, kind: input, shape index: {}]   ;;  %s1777_s10 = inlined_call_operand.vmem [shape: f32[1,128], index: 10, kind: input, shape index: {}]   ;;  %s1778_s11 = inlined_call_operand.vmem [shape: bf16[64,128], index: 11, kind: input, shape index: {}]   ;;  %s1779_s12 = inlined_call_operand.vmem [shape: bf16[128,32], index: 12, kind: input, shape index: {}]   ;;  %s1780_s13 = inlined_call_operand.vmem [shape: f32[1,32], index: 13, kind: input, shape index: {}]   ;;  %s1781_s14 = inlined_call_operand.vmem [shape: f32[62,32], index: 14, kind: output, shape index: {}]   ;;  %s1782_s0 = inlined_call_operand.vmem [shape: f32[62,16], index: 0, kind: input, shape index: {}]   ;;  %s1783_s3 = inlined_call_operand.vmem [shape: bf16[64,32], index: 3, kind: input, shape index: {}]   ;;  %s1784_s2 = inlined_call_operand.vmem [shape: f32[1,64], index: 2, kind: input, shape index: {}]   ;;  %s1785_s4 = inlined_call_operand.vmem [shape: f32[1,32], index: 4, kind: input, shape index: {}]  }
   0x1   :  { %v1306_v0 = vld [vmem:[%s1771_s1] sm:$0xff]   ;;  %v49_v2 = vld [vmem:[%s1782_s0 + $0x8] sm:$0xff]  ;;  %v50_v3 = vld [vmem:[%s1782_s0 + $0x10] sm:$0xff] }
   0x2   :  { %v48_v1 = vld [vmem:[%s1782_s0] sm:$0xff]  ;;  %1120 = vmatprep.subr.bf16.mxu0 %v1306_v0  ;;  %v51_v5 = vld [vmem:[%s1782_s0 + $0x18] sm:$0xff]  ;;  %v53_v7 = vld [vmem:[%s1782_s0 + $0x28] sm:$0xff] }
   0x3   :  { %v56_v4 = vpack.c.bf16 %v49_v2, %v48_v1  ;;  %v52_v6 = vld [vmem:[%s1782_s0 + $0x20] sm:$0xff]  ;;  %1121 = vmatpush3.bf16.msra.mxu0 %v1306_v0  ;;  %v57_v8 = vpack.c.bf16 %v51_v5, %v50_v3  ;;  %v1308_v11 = vld [vmem:[%s1783_s3 + $0x8] sm:$0xff]   ;;  %v54_v12 = vld [vmem:[%s1782_s0 + $0x30] sm:$0xff] }
   0x4   :  { %v58_v9 = vpack.c.bf16 %v53_v7, %v52_v6  ;;  %v1307_v10 = vld [vmem:[%s1783_s3] sm:$0xff]   ;;  %v55_v13 = vld [vmem:[%s1782_s0 + $0x38] sm:$0xff]  ;;  %v1309_v15 = vld [vmem:[%s1783_s3 + $0x10] sm:$0xff]  }
   0x5   :  { %1122 = vmatprep.mubr.msk.bf16.mxu0 %vm75_vm0, %v56_v4  ;;  %1130 = vmatprep.subr.bf16.mxu0 %v1307_v10  ;;  %v59_v14 = vpack.c.bf16 %v55_v13, %v54_v12  ;;  %v1310_v16 = vld [vmem:[%s1783_s3 + $0x18] sm:$0xff]   ;;  %v998_v17 = vld [vmem:[%s1784_s2] ss:$0 sm:$0xff] }
   0x6   :  { %1123 = vmatmul.mubr.msk.bf16.vlgmr.msra.gmra.mrb[0].mxu0 %vm75_vm0, %v57_v8  ;;  %1226 = vmatprep.subr.bf16.mxu1 %v1307_v10  ;;  %v1004_v46 = vld [vmem:[%s1785_s4] ss:$0 sm:$0xff]  ;;  %s1591_s4 = smov 0  }
   0x7   :  { %1126 = vmatprep.mubr.msk.bf16.mxu0 %vm75_vm0, %v58_v9  ;;  %1131 = vmatpush3.bf16.msra.mxu0 %v1307_v10 }
   0x8   :  { %1132 = vmatprep.subr.bf16.mxu0 %v1308_v11  ;;  %1230 = vmatpush3.bf16.msra.mxu1 %v1307_v10 }
   0x9   :  { %1227 = vmatprep.subr.bf16.mxu1 %v1308_v11 }
   0xb   :  { %1133 = vmatpush3.bf16.msra.mxu0 %v1308_v11 }
   0xc   :  { %1231 = vmatpush3.bf16.msra.mxu1 %v1308_v11  ;;  %1134 = vmatprep.subr.bf16.mxu0 %v1309_v15 }
   0xd   :  { %1228 = vmatprep.subr.bf16.mxu1 %v1309_v15 }
   0xe   :  { %1127 = vmatmul.mubr.msk.bf16.gmra.mrb[4].mxu0 %vm75_vm0, %v59_v14 }
   0xf   :  { %1135 = vmatpush3.bf16.msra.mxu0 %v1309_v15 }
  0x10   :  { %1232 = vmatpush3.bf16.msra.mxu1 %v1309_v15  ;;  %1136 = vmatprep.subr.bf16.mxu0 %v1310_v16 }
  0x11   :  { %1229 = vmatprep.subr.bf16.mxu1 %v1310_v16 }
  0x13   :  { %1137 = vmatpush3.bf16.msra.mxu0 %v1310_v16 }
  0x14   :  { %1233 = vmatpush3.bf16.msra.mxu1 %v1310_v16 }
  0xd9   :  { %v1124_v18 = vpop.f32.mrb[0].mxu0 }
  0xda   :  { %v131_v19 = vadd.f32 %v1124_v18, %v998_v17  ;;  %v122_v20 = vpop.f32.mrb[1].mxu0 }
  0xdb   :  { %v123_v21 = vadd.f32 %v998_v17, %v122_v20  ;;  %v1125_v22 = vpop.f32.mrb[2].mxu0 }
  0xdc   :  { %v134_v23 = vadd.f32 %v1125_v22, %v998_v17  ;;  %v125_v24 = vpop.f32.mrb[3].mxu0  ;;  %v155_v26 = vmax.f32 %v131_v19, 0.0 }
  0xdd   :  { %v126_v25 = vadd.f32 %v998_v17, %v125_v24  ;;  %v153_v28 = vmax.f32 %v123_v21, 0.0 }
  0xde   :  { %v156_v27 = vmax.f32 %v134_v23, 0.0 }
  0xdf   :  { %v154_v29 = vmax.f32 %v126_v25, 0.0 }
  0xe0   :  { %v1556_v30 = vpack.c.bf16 %v156_v27, %v155_v26 }
  0xe1   :  { %v1558_v31 = vpack.c.bf16 %v154_v29, %v153_v28  ;;  %v1128_v32 = vpop.f32.mrb[4].mxu0 }
  0xe2   :  { %v147_v33 = vadd.f32 %v1128_v32, %v998_v17  ;;  %v138_v34 = vpop.f32.mrb[5].mxu0 }
  0xe3   :  { %v139_v35 = vadd.f32 %v998_v17, %v138_v34  ;;  %v1129_v36 = vpop.f32.mrb[6].mxu0  ;;  %1138 = vmatprep.mubr.msk.bf16.mxu0 %vm204_vm1, %v1558_v31 }
  0xe4   :  { %v150_v37 = vadd.f32 %v1129_v36, %v998_v17  ;;  %v141_v38 = vpop.f32.mrb[7].mxu0  ;;  %1139 = vmatmul.mubr.msk.bf16.vlgmr.msra.gmra.mrb[8].mxu0 %vm204_vm1, %v1556_v30  ;;  %v159_v40 = vmax.f32 %v147_v33, 0.0 }
  0xe5   :  { %v142_v39 = vadd.f32 %v998_v17, %v141_v38  ;;  %v157_v42 = vmax.f32 %v139_v35, 0.0 }
  0xe6   :  { %v160_v41 = vmax.f32 %v150_v37, 0.0 }
  0xe7   :  { %v158_v43 = vmax.f32 %v142_v39, 0.0 }
  0xe8   :  { %v1564_v44 = vpack.c.bf16 %v160_v41, %v159_v40 }
  0xe9   :  { %v1566_v45 = vpack.c.bf16 %v158_v43, %v157_v42 }
  0xeb   :  { %1142 = vmatprep.mubr.msk.bf16.mxu1 %vm204_vm1, %v1566_v45 }
  0xec   :  { %1143 = vmatmul.mubr.msk.bf16.vlgmr.msra.gmra.mrb[0].mxu1 %vm204_vm1, %v1564_v44 }
 0x1b7   :  { %v1140_v47 = vpop.f32.mrb[8].mxu0 }
 0x1b8   :  { %v260_v48 = vadd.f32 %v1140_v47, %v1004_v46   ;;  %v251_v49 = vpop.f32.mrb[9].mxu0 }
 0x1b9   :  { %v252_v50 = vadd.f32 %v1004_v46, %v251_v49   ;;  %v1141_v51 = vpop.f32.mrb[10].mxu0 }
 0x1ba   :  { %v263_v52 = vadd.f32 %v1141_v51, %v1004_v46   ;;  %v254_v53 = vpop.f32.mrb[11].mxu0 }
 0x1bb   :  { %v255_v54 = vadd.f32 %v1004_v46, %v254_v53  }
 0x1bf   :  { %v1144_v55 = vpop.f32.mrb[0].mxu1 }
 0x1c0   :  { %v276_v56 = vadd.f32 %v1144_v55, %v1004_v46   ;;  %v267_v57 = vpop.f32.mrb[1].mxu1 }
 0x1c1   :  { %v268_v58 = vadd.f32 %v1004_v46, %v267_v57   ;;  %v1145_v59 = vpop.f32.mrb[2].mxu1 }
 0x1c2   :  { %v279_v60 = vadd.f32 %v1145_v59, %v1004_v46   ;;  %v270_v61 = vpop.f32.mrb[3].mxu1 }
 0x1c3   :  { %v271_v62 = vadd.f32 %v1004_v46, %v270_v61  }
 0x1c4 LB: > { %vm327_vm2 = vcmask 261120   ;;  %s1065_s1 = sshll.u32 %s1433_s4, 4  ;;  %v296_v63 = vpack.c.bf16 %v1425_v54, %v1429_v50  ;;  %s1066_s26 = sshll.u32 %s1433_s4, 5  ;;  %v297_v4 = vpack.c.bf16 %v1417_v52, %v1421_v48  ;;  %v298_v5 = vpack.c.bf16 %v1409_v62, %v1413_v58  ;;  %s1433_s4 = sphi %s1591_s4, %s287_s4   ;;  %v1429_v50 = vphi %v252_v50, %v1793_v50   ;;  %v1425_v54 = vphi %v255_v54, %v1792_v54   ;;  %v1421_v48 = vphi %v260_v48, %v1791_v48   ;;  %v1417_v52 = vphi %v263_v52, %v1790_v52   ;;  %v1413_v58 = vphi %v268_v58, %v1789_v58   ;;  %v1409_v62 = vphi %v271_v62, %v1788_v62   ;;  %v1405_v56 = vphi %v276_v56, %v1787_v56   ;;  %v1401_v60 = vphi %v279_v60, %v1786_v60  }
 0x1c5   : > { %s302_s25 = scalar_lea.vmem %s1772_s5, %s1065_s1  ;;  %s419_s29 = scalar_lea.vmem %s1774_s7, %s1066_s26  ;;  %v299_v6 = vpack.c.bf16 %v1401_v60, %v1405_v56 }
 0x1c6   : > { %v1311_v0 = vld [vmem:[%s302_s25] sm:$0xff]   ;;  %1150 = vmatprep.mubr.msk.bf16.mxu0 %vm327_vm2, %v296_v63  ;;  %v1312_v1 = vld [vmem:[%s302_s25 + $0x8] sm:$0xff]   ;;  %v1315_v7 = vld [vmem:[%s419_s29 + $0x10] sm:$0xff]   ;;  %s307_s16 = scalar_lea.vmem %s1773_s6, %s1433_s4  ;;  %s537_s19 = scalar_lea.vmem %s1775_s8, %s1433_s4 }
 0x1c7   : > { %1146 = vmatprep.subr.bf16.mxu0 %v1311_v0  ;;  %v1313_v2 = vld [vmem:[%s419_s29] sm:$0xff]   ;;  %v1314_v3 = vld [vmem:[%s419_s29 + $0x8] sm:$0xff]   ;;  %v1316_v8 = vld [vmem:[%s419_s29 + $0x18] sm:$0xff]   ;;  %s287_s4 = sadd.s32 1, %s1433_s4  }
 0x1c8   : > { %1147 = vmatpush3.bf16.msra.mxu0 %v1311_v0  ;;  %1158 = vmatprep.subr.bf16.mxu1 %v1313_v2  ;;  %v1015_v9 = vld [vmem:[%s307_s16] ss:$0 sm:$0xff]  ;;  %p284_p0 = scmp.ge.s32.totalorder %s287_s4, 4  }
 0x1c9   : > { %1148 = vmatprep.subr.bf16.mxu0 %v1312_v1  ;;  %1159 = vmatpush3.bf16.msra.mxu1 %v1313_v2  ;;  %v1032_v40 = vld [vmem:[%s537_s19] ss:$0 sm:$0xff] }
 0x1ca   : > { %1160 = vmatprep.subr.bf16.mxu1 %v1314_v3 }
 0x1cc   : > { %1149 = vmatpush3.bf16.msra.mxu0 %v1312_v1 }
 0x1cd   : > { %1161 = vmatpush3.bf16.msra.mxu1 %v1314_v3 }
 0x1ce   : > { %1162 = vmatprep.subr.bf16.mxu1 %v1315_v7 }
 0x1cf   : > { %1151 = vmatmul.mubr.msk.bf16.vlgmr.msra.gmra.mrb[0].mxu0 %vm327_vm2, %v297_v4 }
 0x1d0   : > { %1154 = vmatprep.mubr.msk.bf16.mxu0 %vm327_vm2, %v298_v5 }
 0x1d1   : > { %1163 = vmatpush3.bf16.msra.mxu1 %v1315_v7 }
 0x1d2   : > { %1164 = vmatprep.subr.bf16.mxu1 %v1316_v8 }
 0x1d5   : > { %1165 = vmatpush3.bf16.msra.mxu1 %v1316_v8  ;;  %v1317_v8 = vld [vmem:[%s1776_s9] sm:$0xff] (%p284_p0)  }
 0x1d6   :  { %1174 = vmatprep.subr.bf16.mxu1 (%p284_p0), %v1317_v8 }
 0x1d7   : > { %1155 = vmatmul.mubr.msk.bf16.gmra.mrb[4].mxu0 %vm327_vm2, %v299_v6 }
 0x2a2   : > { %v1152_v10 = vpop.f32.mrb[0].mxu0 }
 0x2a3   : > { %v383_v11 = vadd.f32 %v1152_v10, %v1015_v9  ;;  %v374_v12 = vpop.f32.mrb[1].mxu0  ;;  %v1318_v10 = vld [vmem:[%s1776_s9 + $0x8] sm:$0xff] (%p284_p0)  }
 0x2a4   : > { %v375_v13 = vadd.f32 %v1015_v9, %v374_v12  ;;  %v1153_v14 = vpop.f32.mrb[2].mxu0 }
 0x2a5   : > { %v386_v15 = vadd.f32 %v1153_v14, %v1015_v9  ;;  %v377_v16 = vpop.f32.mrb[3].mxu0  ;;  %v407_v18 = vmax.f32 %v383_v11, 0.0  ;;  %v1319_v11 = vld [vmem:[%s1778_s11] sm:$0xff] (%p284_p0)   ;;  %v1328_v14 = vld [vmem:[%s1779_s12 + $0x28] sm:$0xff] (%p284_p0)  }
 0x2a6   : > { %v378_v17 = vadd.f32 %v1015_v9, %v377_v16  ;;  %v405_v20 = vmax.f32 %v375_v13, 0.0  ;;  %v1323_v13 = vld [vmem:[%s1779_s12] sm:$0xff] (%p284_p0)   ;;  %v1330_v16 = vld [vmem:[%s1779_s12 + $0x38] sm:$0xff] (%p284_p0)  }
 0x2a7   : > { %v408_v19 = vmax.f32 %v386_v15, 0.0  ;;  %1202 = vmatprep.subr.bf16.mxu0 (%p284_p0), %v1323_v13  ;;  %v1329_v15 = vld [vmem:[%s1779_s12 + $0x30] sm:$0xff] (%p284_p0)  }
 0x2a8   : > { %v406_v21 = vmax.f32 %v378_v17, 0.0  ;;  %1203 = vmatpush3.bf16.msra.mxu0 (%p284_p0), %v1323_v13  ;;  %v1033_v17 = vld [vmem:[%s1777_s10] ss:$0 sm:$0xff] (%p284_p0) }
 0x2a9   : > { %v414_v22 = vpack.c.bf16 %v408_v19, %v407_v18 }
 0x2aa   : > { %v1156_v23 = vpop.f32.mrb[4].mxu0  ;;  %v413_v24 = vpack.c.bf16 %v406_v21, %v405_v20 }
 0x2ab   : > { %v399_v25 = vadd.f32 %v1156_v23, %v1015_v9  ;;  %v390_v26 = vpop.f32.mrb[5].mxu0 }
 0x2ac   : > { %v391_v27 = vadd.f32 %v1015_v9, %v390_v26  ;;  %v1157_v28 = vpop.f32.mrb[6].mxu0  ;;  %1166 = vmatprep.mubr.msk.bf16.mxu1 %vm204_vm1, %v413_v24 }
 0x2ad   : > { %v402_v29 = vadd.f32 %v1157_v28, %v1015_v9  ;;  %v393_v32 = vpop.f32.mrb[7].mxu0  ;;  %1167 = vmatmul.mubr.msk.bf16.vlgmr.msra.gmra.mrb[0].mxu1 %vm204_vm1, %v414_v22  ;;  %v411_v34 = vmax.f32 %v399_v25, 0.0 }
 0x2ae   : > { %v394_v33 = vadd.f32 %v1015_v9, %v393_v32  ;;  %v409_v36 = vmax.f32 %v391_v27, 0.0  ;;  %1175 = vmatpush3.bf16.msra.mxu1 (%p284_p0), %v1317_v8 }
 0x2af   : > { %v412_v35 = vmax.f32 %v402_v29, 0.0  ;;  %1176 = vmatprep.subr.bf16.mxu1 (%p284_p0), %v1318_v10 }
 0x2b0   : > { %v410_v37 = vmax.f32 %v394_v33, 0.0 }
 0x2b1   : > { %v416_v38 = vpack.c.bf16 %v412_v35, %v411_v34 }
 0x2b2   : > { %v415_v39 = vpack.c.bf16 %v410_v37, %v409_v36  ;;  %1177 = vmatpush3.bf16.msra.mxu1 (%p284_p0), %v1318_v10 }
 0x2b3   :  { %1186 = vmatprep.subr.bf16.mxu1 (%p284_p0), %v1319_v11 }
 0x2b4   : > { %1170 = vmatprep.mubr.msk.bf16.mxu1 %vm204_vm1, %v415_v39 }
 0x2b5   : > { %1171 = vmatmul.mubr.msk.bf16.gmra.mrb[4].mxu1 %vm204_vm1, %v416_v38 }
 0x380   : > { %v1168_v41 = vpop.f32.mrb[0].mxu1 }
 0x381   : > { %v531_v42 = vadd.f32 %v1421_v48, %v1168_v41  ;;  %v498_v43 = vpop.f32.mrb[1].mxu1 }
 0x382   : > { %v529_v46 = vadd.f32 %v1429_v50, %v498_v43  ;;  %v1169_v47 = vpop.f32.mrb[2].mxu1 }
 0x383   : > { %v547_v49 = vadd.f32 %v1032_v40, %v531_v42   ;;  %v532_v51 = vadd.f32 %v1417_v52, %v1169_v47  ;;  %v501_v53 = vpop.f32.mrb[3].mxu1 }
 0x384   : > { %v545_v55 = vadd.f32 %v1032_v40, %v529_v46   ;;  %v530_v57 = vadd.f32 %v1425_v54, %v501_v53 }
 0x385   : > { %v548_v59 = vadd.f32 %v1032_v40, %v532_v51  }
 0x386   : > { %v546_v61 = vadd.f32 %v1032_v40, %v530_v57  }
 0x387   :  { %v554_v12 = vpack.c.bf16 (%p284_p0), %v548_v59, %v547_v49 }
 0x388   : > { %v1172_v63 = vpop.f32.mrb[4].mxu1  ;;  %v1792_v54 = vmov %v546_v61  ;;  %v553_v9 = vpack.c.bf16 (%p284_p0), %v546_v61, %v545_v55 }
 0x389   : > { %v535_v0 = vadd.f32 %v1405_v56, %v1172_v63  ;;  %v514_v1 = vpop.f32.mrb[5].mxu1  ;;  %v1320_v54 = vld [vmem:[%s1778_s11 + $0x8] sm:$0xff] (%p284_p0)  }
 0x38a   : > { %v533_v2 = vadd.f32 %v1413_v58, %v514_v1  ;;  %v1173_v48 = vpop.f32.mrb[6].mxu1  ;;  %286 = sbr.rel (!%p284_p0) target bundleno = 452 (0x1c4), region = 87  ;;  %1178 = vmatprep.mubr.msk.bf16.mxu1 (%p284_p0), %vm327_vm2, %v553_v9 }
 0x38b   : > { %v551_v3 = vadd.f32 %v1032_v40, %v535_v0   ;;  %v536_v50 = vadd.f32 %v1401_v60, %v1173_v48  ;;  %v517_v4 = vpop.f32.mrb[7].mxu1  ;;  %v1791_v48 = vmov %v547_v49  ;;  %1179 = vmatmul.mubr.msk.bf16.vlgmr.msra.gmra.mrb[0].mxu1 (%p284_p0), %vm327_vm2, %v554_v12 }
 0x38c   : > { %v549_v5 = vadd.f32 %v1032_v40, %v533_v2   ;;  %v534_v52 = vadd.f32 %v1409_v62, %v517_v4  ;;  %1187 = vmatpush3.bf16.msra.mxu1 (%p284_p0), %v1319_v11 }
 0x38d   : > { %v552_v6 = vadd.f32 %v1032_v40, %v536_v50   ;;  %v1787_v56 = vmov %v551_v3  ;;  %v1793_v50 = vmov %v545_v55  ;;  %1188 = vmatprep.subr.bf16.mxu1 (%p284_p0), %v1320_v54 }
 0x38e   : > { %v550_v7 = vadd.f32 %v1032_v40, %v534_v52   ;;  %v1789_v58 = vmov %v549_v5  ;;  %v1790_v52 = vmov %v548_v59 }
 0x38f   : > { %v1786_v60 = vmov %v552_v6  ;;  %v1321_v58 = vld [vmem:[%s1778_s11 + $0x10] sm:$0xff] (%p284_p0)  }
 0x390   : > { %v1788_v62 = vmov %v550_v7  ;;  %v555_v56 = vpack.c.bf16 (%p284_p0), %v550_v7, %v549_v5  ;;  %v556_v60 = vpack.c.bf16 (%p284_p0), %v552_v6, %v551_v3  ;;  %1189 = vmatpush3.bf16.msra.mxu1 (%p284_p0), %v1320_v54 }
 0x391   :  { %1190 = vmatprep.subr.bf16.mxu1 %v1321_v58  ;;  %v1322_v62 = vld [vmem:[%s1778_s11 + $0x18] sm:$0xff]  }
 0x392   :  { %1182 = vmatprep.mubr.msk.bf16.mxu1 %vm327_vm2, %v555_v56 }
 0x393   :  { %1183 = vmatmul.mubr.msk.bf16.gmra.mrb[4].mxu1 %vm327_vm2, %v556_v60 }
 0x394   :  { %1191 = vmatpush3.bf16.msra.mxu1 %v1321_v58  ;;  %1194 = vmatprep.mubr.msk.bf16.mxu1 %vm204_vm1, %v1558_v31  ;;  %v1324_v31 = vld [vmem:[%s1779_s12 + $0x8] sm:$0xff]  }
 0x395   :  { %1192 = vmatprep.subr.bf16.mxu1 %v1322_v62  ;;  %1204 = vmatprep.subr.bf16.mxu0 %v1324_v31 }
 0x396   :  { %1205 = vmatpush3.bf16.msra.mxu0 %v1324_v31 }
 0x398   :  { %1193 = vmatpush3.bf16.msra.mxu1 %v1322_v62 }
 0x39b   :  { %1195 = vmatmul.mubr.msk.bf16.vlgmr.msra.gmra.mrb[8].mxu1 %vm204_vm1, %v1556_v30  ;;  %v1325_v30 = vld [vmem:[%s1779_s12 + $0x10] sm:$0xff]  }
 0x39c   :  { %1198 = vmatprep.mubr.msk.bf16.mxu1 %vm204_vm1, %v1566_v45  ;;  %1206 = vmatprep.subr.bf16.mxu0 %v1325_v30  ;;  %v1327_v45 = vld [vmem:[%s1779_s12 + $0x20] sm:$0xff]  }
 0x39d   :  { %1207 = vmatpush3.bf16.msra.mxu0 %v1325_v30 }
 0x3a3   :  { %1199 = vmatmul.mubr.msk.bf16.gmra.mrb[12].mxu1 %vm204_vm1, %v1564_v44  ;;  %v1326_v44 = vld [vmem:[%s1779_s12 + $0x18] sm:$0xff]  }
 0x3a4   :  { %1208 = vmatprep.subr.bf16.mxu0 %v1326_v44 }
 0x3a5   :  { %1209 = vmatpush3.bf16.msra.mxu0 %v1326_v44 }
 0x3a6   :  { %1210 = vmatprep.subr.bf16.mxu0 %v1327_v45 }
 0x3a9   :  { %1211 = vmatpush3.bf16.msra.mxu0 %v1327_v45 }
 0x3aa   :  { %1212 = vmatprep.subr.bf16.mxu0 %v1328_v14 }
 0x3ad   :  { %1213 = vmatpush3.bf16.msra.mxu0 %v1328_v14 }
 0x3ae   :  { %1214 = vmatprep.subr.bf16.mxu0 %v1329_v15 }
 0x3b1   :  { %1215 = vmatpush3.bf16.msra.mxu0 %v1329_v15 }
 0x3b2   :  { %1216 = vmatprep.subr.bf16.mxu0 %v1330_v16 }
 0x3b5   :  { %1217 = vmatpush3.bf16.msra.mxu0 %v1330_v16 }
 0x45e   :  { %v1180_v18 = vpop.f32.mrb[0].mxu1 }
 0x45f   :  { %v636_v19 = vadd.f32 %v1180_v18, %v1033_v17  ;;  %v627_v20 = vpop.f32.mrb[1].mxu1 }
 0x460   :  { %v628_v21 = vadd.f32 %v1033_v17, %v627_v20  ;;  %v1181_v22 = vpop.f32.mrb[2].mxu1 }
 0x461   :  { %v1042_v23 = vmul.f32 -1.442695, %v636_v19  ;;  %v639_v24 = vadd.f32 %v1181_v22, %v1033_v17  ;;  %v630_v25 = vpop.f32.mrb[3].mxu1  ;;  %v1056_v22 = vld [vmem:[%s1780_s13] ss:$0 sm:$0xff] }
 0x462   :  { %v1040_v26 = vmul.f32 -1.442695, %v628_v21  ;;  %v631_v27 = vadd.f32 %v1033_v17, %v630_v25 }
 0x463   :  { %1331 = vpow2.f32 %v1042_v23  ;;  %v1043_v28 = vmul.f32 -1.442695, %v639_v24 }
 0x464   :  { %1333 = vpow2.f32 %v1040_v26  ;;  %v1041_v29 = vmul.f32 -1.442695, %v631_v27 }
 0x465   :  { %1335 = vpow2.f32 %v1043_v28 }
 0x466   :  { %1337 = vpow2.f32 %v1041_v29  ;;  %v1184_v32 = vpop.f32.mrb[4].mxu1 }
 0x467   :  { %v652_v33 = vadd.f32 %v1184_v32, %v1033_v17  ;;  %v643_v34 = vpop.f32.mrb[5].mxu1 }
 0x468   :  { %v644_v35 = vadd.f32 %v1033_v17, %v643_v34  ;;  %v1185_v36 = vpop.f32.mrb[6].mxu1 }
 0x469   :  { %v1046_v37 = vmul.f32 -1.442695, %v652_v33  ;;  %v655_v38 = vadd.f32 %v1185_v36, %v1033_v17  ;;  %v646_v39 = vpop.f32.mrb[7].mxu1 }
 0x46a   :  { %v1044_v40 = vmul.f32 -1.442695, %v644_v35  ;;  %v647_v41 = vadd.f32 %v1033_v17, %v646_v39 }
 0x46b   :  { %1339 = vpow2.f32 %v1046_v37  ;;  %v1047_v42 = vmul.f32 -1.442695, %v655_v38 }
 0x46c   :  { %1341 = vpow2.f32 %v1044_v40  ;;  %v1045_v43 = vmul.f32 -1.442695, %v647_v41 }
 0x46d   :  { %v1332_v46 = vpop.eup %1331  ;;  %1343 = vpow2.f32 %v1047_v42 }
 0x46e   :  { %v1334_v47 = vpop.eup %1333  ;;  %v684_v49 = vadd.f32 1.0, %v1332_v46  ;;  %1345 = vpow2.f32 %v1045_v43  ;;  %v1196_v51 = vpop.f32.mrb[8].mxu1 }
 0x46f   :  { %v1336_v53 = vpop.eup %1335  ;;  %v682_v55 = vadd.f32 1.0, %v1334_v47  ;;  %v772_v57 = vpop.f32.mrb[9].mxu1 }
 0x470   :  { %v1338_v59 = vpop.eup %1337  ;;  %1347 = vrcp.f32 %v684_v49  ;;  %v685_v61 = vadd.f32 1.0, %v1336_v53  ;;  %v1197_v63 = vpop.f32.mrb[10].mxu1 }
 0x471   :  { %1349 = vrcp.f32 %v682_v55  ;;  %v683_v0 = vadd.f32 1.0, %v1338_v59  ;;  %v775_v1 = vpop.f32.mrb[11].mxu1 }
 0x472   :  { %1351 = vrcp.f32 %v685_v61 }
 0x473   :  { %1353 = vrcp.f32 %v683_v0 }
 0x475   :  { %v1340_v2 = vpop.eup %1339 }
 0x476   :  { %v1342_v48 = vpop.eup %1341  ;;  %v688_v3 = vadd.f32 1.0, %v1340_v2  ;;  %v1200_v50 = vpop.f32.mrb[12].mxu1 }
 0x477   :  { %v1344_v4 = vpop.eup %1343  ;;  %v686_v5 = vadd.f32 1.0, %v1342_v48  ;;  %v788_v52 = vpop.f32.mrb[13].mxu1 }
 0x478   :  { %v1346_v6 = vpop.eup %1345  ;;  %1355 = vrcp.f32 %v688_v3  ;;  %v689_v7 = vadd.f32 1.0, %v1344_v4  ;;  %v1201_v8 = vpop.f32.mrb[14].mxu1 }
 0x479   :  { %1357 = vrcp.f32 %v686_v5  ;;  %v687_v9 = vadd.f32 1.0, %v1346_v6  ;;  %v791_v10 = vpop.f32.mrb[15].mxu1 }
 0x47a   :  { %v1348_v11 = vpop.eup %1347  ;;  %1359 = vrcp.f32 %v689_v7 }
 0x47b   :  { %v1350_v12 = vpop.eup %1349  ;;  %1361 = vrcp.f32 %v687_v9  ;;  %v805_v54 = vmul.f32 %v1348_v11, %v1196_v51 }
 0x47c   :  { %v1352_v56 = vpop.eup %1351  ;;  %v803_v58 = vmul.f32 %v1350_v12, %v772_v57 }
 0x47d   :  { %v1354_v60 = vpop.eup %1353  ;;  %v806_v62 = vmul.f32 %v1352_v56, %v1197_v63 }
 0x47e   :  { %v804_v13 = vmul.f32 %v1354_v60, %v775_v1 }
 0x47f   :  { %v812_v31 = vpack.c.bf16 %v806_v62, %v805_v54 }
 0x480   :  { %v811_v30 = vpack.c.bf16 %v804_v13, %v803_v58 }
 0x482   :  { %v1356_v44 = vpop.eup %1355  ;;  %1218 = vmatprep.mubr.bf16.mxu0 %v811_v30 }
 0x483   :  { %v1358_v45 = vpop.eup %1357  ;;  %v809_v14 = vmul.f32 %v1356_v44, %v1200_v50  ;;  %1219 = vmatmul.mubr.bf16.vlgmr.msra.gmra.mrb[0].mxu0 %v812_v31 }
 0x484   :  { %v1360_v15 = vpop.eup %1359  ;;  %v807_v16 = vmul.f32 %v1358_v45, %v788_v52 }
 0x485   :  { %v1362_v17 = vpop.eup %1361  ;;  %v810_v18 = vmul.f32 %v1360_v15, %v1201_v8 }
 0x486   :  { %v808_v19 = vmul.f32 %v1362_v17, %v791_v10 }
 0x487   :  { %v814_v20 = vpack.c.bf16 %v810_v18, %v809_v14 }
 0x488   :  { %v813_v21 = vpack.c.bf16 %v808_v19, %v807_v16 }
 0x48a   :  { %1222 = vmatprep.mubr.bf16.mxu0 %v813_v21 }
 0x48b   :  { %1223 = vmatmul.mubr.bf16.gmra.mrb[4].mxu0 %v814_v20 }
 0x556   :  { %v1220_v23 = vpop.f32.mrb[0].mxu0 }
 0x557   :  { %v929_v24 = vadd.f32 %v1220_v23, %v1056_v22  ;;  %v920_v25 = vpop.f32.mrb[1].mxu0 }
 0x558   :  { %v921_v26 = vadd.f32 %v1056_v22, %v920_v25  ;;  %v1221_v27 = vpop.f32.mrb[2].mxu0 }
 0x559   :  { %953 = vst.msk [vmem:[%s1781_s14 + $0x10] sm:$0xff] %vm327_vm2, %v929_v24  ;;  %v932_v28 = vadd.f32 %v1221_v27, %v1056_v22  ;;  %v923_v29 = vpop.f32.mrb[3].mxu0 }
 0x55a   :  { %951 = vst.msk [vmem:[%s1781_s14] sm:$0xff] %vm327_vm2, %v921_v26  ;;  %v924_v32 = vadd.f32 %v1056_v22, %v923_v29 }
 0x55b   :  { %954 = vst.msk [vmem:[%s1781_s14 + $0x18] sm:$0xff] %vm327_vm2, %v932_v28 }
 0x55c   :  { %952 = vst.msk [vmem:[%s1781_s14 + $0x8] sm:$0xff] %vm327_vm2, %v924_v32 }
 0x55e   :  { %v1224_v33 = vpop.f32.mrb[4].mxu0 }
 0x55f   :  { %v945_v34 = vadd.f32 %v1224_v33, %v1056_v22  ;;  %v936_v35 = vpop.f32.mrb[5].mxu0 }
 0x560   :  { %v937_v36 = vadd.f32 %v1056_v22, %v936_v35  ;;  %v1225_v37 = vpop.f32.mrb[6].mxu0 }
 0x561   :  { %957 = vst.msk [vmem:[%s1781_s14 + $0x30] sm:$0xff] %vm327_vm2, %v945_v34  ;;  %v948_v38 = vadd.f32 %v1225_v37, %v1056_v22  ;;  %v939_v39 = vpop.f32.mrb[7].mxu0 }
 0x562   :  { %955 = vst.msk [vmem:[%s1781_s14 + $0x20] sm:$0xff] %vm327_vm2, %v937_v36  ;;  %v940_v40 = vadd.f32 %v1056_v22, %v939_v39 }
 0x563   :  { %958 = vst.msk [vmem:[%s1781_s14 + $0x38] sm:$0xff] %vm327_vm2, %v948_v38 }
 0x564   :  { %956 = vst.msk [vmem:[%s1781_s14 + $0x28] sm:$0xff] %vm327_vm2, %v940_v40 }

</bundles_post_ra>
